<compile_context>
chip_gen: v5e
topology: v5e:2x2
jax: 0.10.0
libtpu: 0.0.40
codegen_flags: <defaults>
</compile_context>

<pallas_src>
import functools

import jax
import jax.numpy as jnp
from jax import lax
from jax.experimental import pallas as pl
from jax.experimental.pallas import tpu as pltpu


def _round_up(x, m):
    return ((x + m - 1) // m) * m


# ----------------------------------------------------------------------------
# Kernel 1: fused linear (+ optional tanh) encoder  —  y = act(x @ W + b)
# Row-tiled grid, bf16 MXU inputs, f32 accumulation / activation.
# ----------------------------------------------------------------------------
def _linear_kernel(x_ref, w_ref, b_ref, o_ref, *, apply_tanh):
    y = jnp.dot(x_ref[...], w_ref[...], preferred_element_type=jnp.float32)
    y = y + b_ref[...]                     # (1, N) broadcasts over rows
    if apply_tanh:
        y = jnp.tanh(y)                    # f32 EUP path (v5e has no bf16 EUP)
    o_ref[...] = y.astype(o_ref.dtype)


def linear_encode(x, w, b, *, apply_tanh, tile_m=512):
    """y = act(x @ w + b). Rows tiled (multiple of 8 sublanes, capped at
    tile_m=512 which stays well inside the 64 MiB v7x VMEM)."""
    M, K = x.shape
    Kw, N = w.shape
    assert K == Kw
    tm = min(tile_m, _round_up(M, 8))
    M_pad = _round_up(M, tm)
    if M_pad != M:
        x = jnp.pad(x, ((0, M_pad - M), (0, 0)))
    grid_m = M_pad // tm

    out = pl.pallas_call(
        functools.partial(_linear_kernel, apply_tanh=apply_tanh),
        out_shape=jax.ShapeDtypeStruct((M_pad, N), jnp.float32),
        grid=(grid_m,),
        in_specs=[
            pl.BlockSpec((tm, K), lambda i: (i, 0)),
            pl.BlockSpec((K, N), lambda i: (0, 0)),
            pl.BlockSpec((1, N), lambda i: (0, 0)),
        ],
        out_specs=pl.BlockSpec((tm, N), lambda i: (i, 0)),
        compiler_params=pltpu.CompilerParams(
            dimension_semantics=("parallel",)),
    )(x.astype(jnp.bfloat16), w.astype(jnp.bfloat16),
      b.reshape(1, N).astype(jnp.float32))
    return out[:M]


# ----------------------------------------------------------------------------
# Kernel 2: fused losses — InfoNCE contrastive + Sinkhorn OT + score-field.
# Single pallas_call; output is a lane-dense (1, 128) slab:
#   lane 0 = contrastive, lane 1 = sinkhorn, lane 2 = score-field.
# ----------------------------------------------------------------------------
def _fused_loss_kernel(e_ref, p_ref, n_ref, w_ref, pt_ref, pg_ref, o_ref,
                       *, tau, eps, n_iters):
    E = e_ref[...]            # (T, D)  anchor trajectory state embeddings
    P = p_ref[...]            # (Pp, D) positive trajectory global embeddings
    Ng = n_ref[...]           # (Nn, D) negative trajectory global embeddings
    w = w_ref[...]            # (Nn, 1) negative weights
    Pm = pt_ref[...]          # (Np, D) projected prompt token embeddings
    g = pg_ref[...]           # (1, D)  projected prompt global embedding

    f32 = jnp.float32
    T = E.shape[0]
    Np = Pm.shape[0]
    tiny = 1e-8
    contract_last = (((1,), (1,)), ((), ()))   # contract last dims of both

    # ---- InfoNCE contrastive loss -------------------------------------------
    a = jnp.mean(E, axis=0, keepdims=True)                               # (1, D)
    a_n = a * lax.rsqrt(jnp.sum(a * a, axis=-1, keepdims=True) + tiny)
    p_n = P * lax.rsqrt(jnp.sum(P * P, axis=-1, keepdims=True) + tiny)
    n_n = Ng * lax.rsqrt(jnp.sum(Ng * Ng, axis=-1, keepdims=True) + tiny)
    inv_tau = 1.0 / tau
    s_pos = lax.dot_general(p_n, a_n, contract_last,
                            preferred_element_type=f32) * inv_tau        # (Pp, 1)
    s_neg = lax.dot_general(n_n, a_n, contract_last,
                            preferred_element_type=f32) * inv_tau        # (Nn, 1)
    m = jnp.maximum(jnp.max(s_pos), jnp.max(s_neg))
    e_pos = jnp.sum(jnp.exp(s_pos - m))
    e_neg = jnp.sum(w * jnp.exp(s_neg - m))
    loss_c = -(jnp.log(e_pos + 1e-12) - jnp.log(e_pos + e_neg + 1e-12))

    # ---- entropic Sinkhorn OT alignment (log-domain, 1/eps-scaled) ----------
    p2 = jnp.sum(Pm * Pm, axis=-1, keepdims=True)                        # (Np, 1)
    e2 = jnp.sum(E * E, axis=-1, keepdims=True)                          # (T, 1)
    PE = lax.dot_general(Pm, E, contract_last,
                         preferred_element_type=f32)                     # (Np, T)
    C = p2 + e2.T - 2.0 * PE                                             # (Np, T)
    Cs = C * (1.0 / eps)                  # scaled cost, hoisted out of the loop
    log_mu = -jnp.log(f32(Np))
    log_nu = -jnp.log(f32(T))

    def lse_rows(x):   # logsumexp over last axis -> (rows, 1)
        mm = jnp.max(x, axis=-1, keepdims=True)
        return mm + jnp.log(jnp.sum(jnp.exp(x - mm), axis=-1, keepdims=True))

    def lse_cols(x):   # logsumexp over first axis -> (1, cols)
        mm = jnp.max(x, axis=0, keepdims=True)
        return mm + jnp.log(jnp.sum(jnp.exp(x - mm), axis=0, keepdims=True))

    def body(_, carry):
        fs, gs = carry                                   # scaled potentials f/eps, g/eps
        fs_new = log_mu - lse_rows(gs - Cs)              # (Np, 1)
        gs_new = log_nu - lse_cols(fs_new - Cs)          # (1, T)
        return (fs_new, gs_new)

    fs0 = jnp.zeros((Np, 1), f32)
    gs0 = jnp.zeros((1, T), f32)
    fs, gs = lax.fori_loop(0, n_iters, body, (fs0, gs0), unroll=True)
    plan = jnp.exp(fs + gs - Cs)                         # transport plan (Np, T)
    loss_s = eps * jnp.sum(plan * Cs)                    # == <plan, C>

    # ---- score-field loss ----------------------------------------------------
    d = E - g
    loss_sf = jnp.sum(d * d) * (1.0 / f32(T))

    # ---- lane-dense writeback ------------------------------------------------
    lane = lax.broadcasted_iota(jnp.int32, (1, 128), 1)
    out = (jnp.where(lane == 0, loss_c, 0.0)
           + jnp.where(lane == 1, loss_s, 0.0)
           + jnp.where(lane == 2, loss_sf, 0.0))
    o_ref[...] = out.astype(o_ref.dtype)


def fused_losses(anchor_states, pos_embs, neg_embs, neg_weights,
                 prompt_proj, prompt_global_proj,
                 *, tau=0.1, eps=0.1, n_iters=20):
    T, D = anchor_states.shape
    Pp = pos_embs.shape[0]
    Nn = neg_embs.shape[0]
    Np = prompt_proj.shape[0]
    out = pl.pallas_call(
        functools.partial(_fused_loss_kernel, tau=tau, eps=eps, n_iters=n_iters),
        out_shape=jax.ShapeDtypeStruct((1, 128), jnp.float32),
        grid=(1,),
        in_specs=[
            pl.BlockSpec((T, D), lambda i: (0, 0)),
            pl.BlockSpec((Pp, D), lambda i: (0, 0)),
            pl.BlockSpec((Nn, D), lambda i: (0, 0)),
            pl.BlockSpec((Nn, 1), lambda i: (0, 0)),
            pl.BlockSpec((Np, D), lambda i: (0, 0)),
            pl.BlockSpec((1, D), lambda i: (0, 0)),
        ],
        out_specs=pl.BlockSpec((1, 128), lambda i: (0, 0)),
    )(anchor_states.astype(jnp.float32),
      pos_embs.astype(jnp.float32),
      neg_embs.astype(jnp.float32),
      neg_weights.reshape(Nn, 1).astype(jnp.float32),
      prompt_proj.astype(jnp.float32),
      prompt_global_proj.astype(jnp.float32))
    return out[0, 0], out[0, 1], out[0, 2]


# ----------------------------------------------------------------------------
# ReflectionHead forward (glue in plain JAX, hot paths in the kernels above)
# ----------------------------------------------------------------------------
def init_params(key, input_dim, d_prompt, d_embed):
    k1, k2, k3, k4 = jax.random.split(key, 4)
    return {
        "w_enc": 0.1 * jax.random.normal(k1, (input_dim, d_embed), jnp.float32),
        "b_enc": 0.01 * jax.random.normal(k2, (d_embed,), jnp.float32),
        "w_proj": 0.1 * jax.random.normal(k3, (d_prompt, d_embed), jnp.float32),
        "b_proj": 0.01 * jax.random.normal(k4, (d_embed,), jnp.float32),
    }


def reflection_head_forward(params, anchor_traj, pos_trajs, neg_trajs,
                            prompt_token_embeddings, prompt_global_embedding,
                            sinkhorn_weight, score_field_weight,
                            neg_weights=None, gamma=0.99):
    T, input_dim = anchor_traj.shape
    num_pos, num_neg = len(pos_trajs), len(neg_trajs)
    if neg_weights is None:
        neg_weights = jnp.ones((num_neg,), jnp.float32)

    # --- RCE state encoder: ONE fused pass over anchor + pos + neg -----------
    all_traj = jnp.concatenate([anchor_traj] + list(pos_trajs) + list(neg_trajs),
                               axis=0)                                   # ((1+P+Nn)*T, in)
    all_states = linear_encode(all_traj, params["w_enc"], params["b_enc"],
                               apply_tanh=True)                          # ((1+P+Nn)*T, D)
    d_embed = all_states.shape[-1]
    anchor_state_embeddings = all_states[:T]                             # (T, D)
    pos_states = all_states[T:T + num_pos * T]
    neg_states = all_states[T + num_pos * T:]
    pos_embs = jnp.mean(pos_states.reshape(num_pos, T, d_embed), axis=1) # (P, D)
    neg_embs = jnp.mean(neg_states.reshape(num_neg, T, d_embed), axis=1) # (Nn, D)

    # --- prompt projection: ONE fused pass over tokens + global --------------
    prompt_all = jnp.concatenate(
        [prompt_token_embeddings, prompt_global_embedding.reshape(1, -1)], axis=0)
    prompt_all_proj = linear_encode(prompt_all, params["w_proj"], params["b_proj"],
                                    apply_tanh=False)                    # (N+1, D)
    prompt_proj = prompt_all_proj[:-1]                                   # (N, D)
    prompt_global_proj = prompt_all_proj[-1:]                            # (1, D)

    # --- fused losses (single Pallas kernel) ----------------------------------
    c_loss, s_loss, sf_loss = fused_losses(
        anchor_state_embeddings, pos_embs, neg_embs, neg_weights,
        prompt_proj, prompt_global_proj, tau=0.1, eps=0.1, n_iters=20)

    total_loss = c_loss + sinkhorn_weight * s_loss + score_field_weight * sf_loss

    # TODO(synk): cgf_module(loss, anchor_emb, level) performs a policy-gradient
    # side effect (backward + optimizer step) with no Pallas forward equivalent.

    loss_breakdown = {
        "contrastive_loss": c_loss,
        "sinkhorn_loss": s_loss,
        "score_field_loss": sf_loss,
        "total_loss": total_loss,
    }
    return total_loss, loss_breakdown


# Jit the whole forward; losses stay on-device (no float() host syncs inside).
reflection_head_forward_jit = jax.jit(reflection_head_forward)


# ----------------------------------------------------------------------------
if __name__ == "__main__":
    T, INPUT_DIM, D_EMBED = 8, 32, 32
    N_PROMPT, D_PROMPT = 8, 16
    NUM_POS, NUM_NEG = 2, 3

    params = init_params(jax.random.PRNGKey(42), INPUT_DIM, D_PROMPT, D_EMBED)

    key = jax.random.PRNGKey(0)
    ks = jax.random.split(key, 8)
    anchor_traj = jax.random.normal(ks[0], (T, INPUT_DIM), jnp.float32)
    pos_trajs = [jax.random.normal(ks[1 + i], (T, INPUT_DIM), jnp.float32)
                 for i in range(NUM_POS)]
    neg_trajs = [jax.random.normal(ks[3 + i], (T, INPUT_DIM), jnp.float32)
                 for i in range(NUM_NEG)]
    prompt_token_embeddings = jax.random.normal(ks[6], (N_PROMPT, D_PROMPT), jnp.float32)
    prompt_global_embedding = jax.random.normal(ks[7], (D_PROMPT,), jnp.float32)
    neg_weights = jnp.array([1.0, 0.5, 0.25], jnp.float32)

    total_loss, breakdown = reflection_head_forward_jit(
        params, anchor_traj, pos_trajs, neg_trajs,
        prompt_token_embeddings, prompt_global_embedding,
        0.5, 0.25, neg_weights)
    jax.block_until_ready(total_loss)

    assert jnp.isfinite(total_loss)
    assert all(jnp.isfinite(v) for v in breakdown.values())
    print("KERNEL_OK")
</pallas_src>

<mosaic_0001>
module attributes {stable_mosaic.version = 11 : i64} {
  func.func @_linear_kernel(%arg0: i32, %arg1: memref<16x16xbf16, #tpu.memory_space<vmem>>, %arg2: memref<16x32xbf16, #tpu.memory_space<vmem>>, %arg3: memref<1x32xf32, #tpu.memory_space<vmem>>, %arg4: memref<16x32xf32, #tpu.memory_space<vmem>>) attributes {dimension_semantics = [#tpu.dimension_semantics<parallel>], iteration_bounds = array<i64: 1>, scalar_prefetch = 0 : i64, scratch_operands = 0 : i64, tpu.core_type = #tpu.core_type<tc>, window_params = [{transform_indices = @transform_0, window_bounds = array<i64: 16, 16>}, {pipeline_mode = #tpu.pipeline_mode<synchronous>, transform_indices = @transform_1, window_bounds = array<i64: 16, 32>}, {pipeline_mode = #tpu.pipeline_mode<synchronous>, transform_indices = @transform_2, window_bounds = array<i64: 1, 32>}, {transform_indices = @transform_3, window_bounds = array<i64: 16, 32>}]} {
    %c0 = arith.constant 0 : index
    %c0_0 = arith.constant 0 : index
    %0 = vector.load %arg1[%c0, %c0_0] : memref<16x16xbf16, #tpu.memory_space<vmem>>, vector<16x16xbf16>
    %c0_1 = arith.constant 0 : index
    %c0_2 = arith.constant 0 : index
    %1 = vector.load %arg2[%c0_1, %c0_2] : memref<16x32xbf16, #tpu.memory_space<vmem>>, vector<16x32xbf16>
    %cst = arith.constant dense<0.000000e+00> : vector<16x32xf32>
    %2 = tpu.matmul %0, %1, %cst {dimension_numbers = #tpu.dot_dimension_numbers<[1], [0], [0], [1], [0, 0, 1, 1], [], []>} : vector<16x16xbf16>, vector<16x32xbf16>, vector<16x32xf32> -> vector<16x32xf32>
    %c0_3 = arith.constant 0 : index
    %c0_4 = arith.constant 0 : index
    %3 = vector.load %arg3[%c0_3, %c0_4] : memref<1x32xf32, #tpu.memory_space<vmem>>, vector<1x32xf32>
    %4 = vector.broadcast %3 : vector<1x32xf32> to vector<16x32xf32>
    %5 = arith.addf %2, %4 : vector<16x32xf32>
    %c0_5 = arith.constant 0 : index
    %c0_6 = arith.constant 0 : index
    %6 = vector.load %arg4[%c0_5, %c0_6] : memref<16x32xf32, #tpu.memory_space<vmem>>, vector<16x32xf32>
    tpu.vector_store %arg4[%c0_5, %c0_6], %5 {strides = array<i32>} : memref<16x32xf32, #tpu.memory_space<vmem>>, vector<16x32xf32>,
    return
  }
  func.func @transform_0(%arg0: i32) -> (i32, i32) {
    %c0_i32 = arith.constant 0 : i32
    %c0_i32_0 = arith.constant 0 : i32
    return %arg0, %c0_i32 : i32, i32
  }
  func.func @transform_1(%arg0: i32) -> (i32, i32) {
    %c0_i32 = arith.constant 0 : i32
    %c0_i32_0 = arith.constant 0 : i32
    %c0_i32_1 = arith.constant 0 : i32
    return %c0_i32, %c0_i32_0 : i32, i32
  }
  func.func @transform_2(%arg0: i32) -> (i32, i32) {
    %c0_i32 = arith.constant 0 : i32
    %c0_i32_0 = arith.constant 0 : i32
    %c0_i32_1 = arith.constant 0 : i32
    return %c0_i32, %c0_i32_0 : i32, i32
  }
  func.func @transform_3(%arg0: i32) -> (i32, i32) {
    %c0_i32 = arith.constant 0 : i32
    %c0_i32_0 = arith.constant 0 : i32
    return %arg0, %c0_i32 : i32, i32
  }
}

module attributes {stable_mosaic.version = 11 : i64} {
  func.func @_linear_kernel(%arg0: i32, %arg1: memref<48x32xbf16, #tpu.memory_space<vmem>>, %arg2: memref<32x32xbf16, #tpu.memory_space<vmem>>, %arg3: memref<1x32xf32, #tpu.memory_space<vmem>>, %arg4: memref<48x32xf32, #tpu.memory_space<vmem>>) attributes {dimension_semantics = [#tpu.dimension_semantics<parallel>], iteration_bounds = array<i64: 1>, scalar_prefetch = 0 : i64, scratch_operands = 0 : i64, tpu.core_type = #tpu.core_type<tc>, window_params = [{transform_indices = @transform_0, window_bounds = array<i64: 48, 32>}, {pipeline_mode = #tpu.pipeline_mode<synchronous>, transform_indices = @transform_1, window_bounds = array<i64: 32, 32>}, {pipeline_mode = #tpu.pipeline_mode<synchronous>, transform_indices = @transform_2, window_bounds = array<i64: 1, 32>}, {transform_indices = @transform_3, window_bounds = array<i64: 48, 32>}]} {
    %c0 = arith.constant 0 : index
    %c0_0 = arith.constant 0 : index
    %0 = vector.load %arg1[%c0, %c0_0] : memref<48x32xbf16, #tpu.memory_space<vmem>>, vector<48x32xbf16>
    %c0_1 = arith.constant 0 : index
    %c0_2 = arith.constant 0 : index
    %1 = vector.load %arg2[%c0_1, %c0_2] : memref<32x32xbf16, #tpu.memory_space<vmem>>, vector<32x32xbf16>
    %cst = arith.constant dense<0.000000e+00> : vector<48x32xf32>
    %2 = tpu.matmul %0, %1, %cst {dimension_numbers = #tpu.dot_dimension_numbers<[1], [0], [0], [1], [0, 0, 1, 1], [], []>} : vector<48x32xbf16>, vector<32x32xbf16>, vector<48x32xf32> -> vector<48x32xf32>
    %c0_3 = arith.constant 0 : index
    %c0_4 = arith.constant 0 : index
    %3 = vector.load %arg3[%c0_3, %c0_4] : memref<1x32xf32, #tpu.memory_space<vmem>>, vector<1x32xf32>
    %4 = vector.broadcast %3 : vector<1x32xf32> to vector<48x32xf32>
    %5 = arith.addf %2, %4 : vector<48x32xf32>
    %6 = math.tanh %5 : vector<48x32xf32>
    %c0_5 = arith.constant 0 : index
    %c0_6 = arith.constant 0 : index
    %7 = vector.load %arg4[%c0_5, %c0_6] : memref<48x32xf32, #tpu.memory_space<vmem>>, vector<48x32xf32>
    tpu.vector_store %arg4[%c0_5, %c0_6], %6 {strides = array<i32>} : memref<48x32xf32, #tpu.memory_space<vmem>>, vector<48x32xf32>,
    return
  }
  func.func @transform_0(%arg0: i32) -> (i32, i32) {
    %c0_i32 = arith.constant 0 : i32
    %c0_i32_0 = arith.constant 0 : i32
    return %arg0, %c0_i32 : i32, i32
  }
  func.func @transform_1(%arg0: i32) -> (i32, i32) {
    %c0_i32 = arith.constant 0 : i32
    %c0_i32_0 = arith.constant 0 : i32
    %c0_i32_1 = arith.constant 0 : i32
    return %c0_i32, %c0_i32_0 : i32, i32
  }
  func.func @transform_2(%arg0: i32) -> (i32, i32) {
    %c0_i32 = arith.constant 0 : i32
    %c0_i32_0 = arith.constant 0 : i32
    %c0_i32_1 = arith.constant 0 : i32
    return %c0_i32, %c0_i32_0 : i32, i32
  }
  func.func @transform_3(%arg0: i32) -> (i32, i32) {
    %c0_i32 = arith.constant 0 : i32
    %c0_i32_0 = arith.constant 0 : i32
    return %arg0, %c0_i32 : i32, i32
  }
}

module attributes {stable_mosaic.version = 11 : i64} {
  func.func @_fused_loss_kernel(%arg0: i32, %arg1: memref<8x32xf32, #tpu.memory_space<vmem>>, %arg2: memref<2x32xf32, #tpu.memory_space<vmem>>, %arg3: memref<3x32xf32, #tpu.memory_space<vmem>>, %arg4: memref<3x1xf32, #tpu.memory_space<vmem>>, %arg5: memref<8x32xf32, #tpu.memory_space<vmem>>, %arg6: memref<1x32xf32, #tpu.memory_space<vmem>>, %arg7: memref<1x128xf32, #tpu.memory_space<vmem>>) attributes {dimension_semantics = [#tpu.dimension_semantics<arbitrary>], iteration_bounds = array<i64: 1>, scalar_prefetch = 0 : i64, scratch_operands = 0 : i64, tpu.core_type = #tpu.core_type<tc>, window_params = [{pipeline_mode = #tpu.pipeline_mode<synchronous>, transform_indices = @transform_0, window_bounds = array<i64: 8, 32>}, {pipeline_mode = #tpu.pipeline_mode<synchronous>, transform_indices = @transform_1, window_bounds = array<i64: 2, 32>}, {pipeline_mode = #tpu.pipeline_mode<synchronous>, transform_indices = @transform_2, window_bounds = array<i64: 3, 32>}, {pipeline_mode = #tpu.pipeline_mode<synchronous>, transform_indices = @transform_3, window_bounds = array<i64: 3, 1>}, {pipeline_mode = #tpu.pipeline_mode<synchronous>, transform_indices = @transform_4, window_bounds = array<i64: 8, 32>}, {pipeline_mode = #tpu.pipeline_mode<synchronous>, transform_indices = @transform_5, window_bounds = array<i64: 1, 32>}, {pipeline_mode = #tpu.pipeline_mode<synchronous>, transform_indices = @transform_6, window_bounds = array<i64: 1, 128>}]} {
    %c0 = arith.constant 0 : index
    %c0_0 = arith.constant 0 : index
    %0 = vector.load %arg1[%c0, %c0_0] : memref<8x32xf32, #tpu.memory_space<vmem>>, vector<8x32xf32>
    %c0_1 = arith.constant 0 : index
    %c0_2 = arith.constant 0 : index
    %1 = vector.load %arg2[%c0_1, %c0_2] : memref<2x32xf32, #tpu.memory_space<vmem>>, vector<2x32xf32>
    %c0_3 = arith.constant 0 : index
    %c0_4 = arith.constant 0 : index
    %2 = vector.load %arg3[%c0_3, %c0_4] : memref<3x32xf32, #tpu.memory_space<vmem>>, vector<3x32xf32>
    %c0_5 = arith.constant 0 : index
    %c0_6 = arith.constant 0 : index
    %3 = vector.load %arg4[%c0_5, %c0_6] : memref<3x1xf32, #tpu.memory_space<vmem>>, vector<3x1xf32>
    %c0_7 = arith.constant 0 : index
    %c0_8 = arith.constant 0 : index
    %4 = vector.load %arg5[%c0_7, %c0_8] : memref<8x32xf32, #tpu.memory_space<vmem>>, vector<8x32xf32>
    %c0_9 = arith.constant 0 : index
    %c0_10 = arith.constant 0 : index
    %5 = vector.load %arg6[%c0_9, %c0_10] : memref<1x32xf32, #tpu.memory_space<vmem>>, vector<1x32xf32>
    %cst = arith.constant dense<0.000000e+00> : vector<32xf32>
    %6 = vector.multi_reduction <add>, %0, %cst [0] : vector<8x32xf32> to vector<32xf32>
    %7 = vector.shape_cast %6 : vector<32xf32> to vector<1x32xf32>
    %cst_11 = arith.constant 8.000000e+00 : f32
    %8 = vector.broadcast %cst_11 : f32 to vector<1x32xf32>
    %9 = arith.divf %7, %8 : vector<1x32xf32>
    %10 = arith.mulf %9, %9 : vector<1x32xf32>
    %cst_12 = arith.constant dense<0.000000e+00> : vector<1xf32>
    %11 = vector.multi_reduction <add>, %10, %cst_12 [1] : vector<1x32xf32> to vector<1xf32>
    %12 = vector.shape_cast %11 : vector<1xf32> to vector<1x1xf32>
    %cst_13 = arith.constant 9.99999993E-9 : f32
    %13 = vector.broadcast %cst_13 : f32 to vector<1x1xf32>
    %14 = arith.addf %12, %13 : vector<1x1xf32>
    %15 = math.rsqrt %14 : vector<1x1xf32>
    %16 = vector.broadcast %15 : vector<1x1xf32> to vector<1x32xf32>
    %17 = arith.mulf %9, %16 : vector<1x32xf32>
    %18 = arith.mulf %1, %1 : vector<2x32xf32>
    %cst_14 = arith.constant dense<0.000000e+00> : vector<2xf32>
    %19 = vector.multi_reduction <add>, %18, %cst_14 [1] : vector<2x32xf32> to vector<2xf32>
    %20 = vector.shape_cast %19 : vector<2xf32> to vector<2x1xf32>
    %cst_15 = arith.constant 9.99999993E-9 : f32
    %21 = vector.broadcast %cst_15 : f32 to vector<2x1xf32>
    %22 = arith.addf %20, %21 : vector<2x1xf32>
    %23 = math.rsqrt %22 : vector<2x1xf32>
    %24 = vector.broadcast %23 : vector<2x1xf32> to vector<2x32xf32>
    %25 = arith.mulf %1, %24 : vector<2x32xf32>
    %26 = arith.mulf %2, %2 : vector<3x32xf32>
    %cst_16 = arith.constant dense<0.000000e+00> : vector<3xf32>
    %27 = vector.multi_reduction <add>, %26, %cst_16 [1] : vector<3x32xf32> to vector<3xf32>
    %28 = vector.shape_cast %27 : vector<3xf32> to vector<3x1xf32>
    %cst_17 = arith.constant 9.99999993E-9 : f32
    %29 = vector.broadcast %cst_17 : f32 to vector<3x1xf32>
    %30 = arith.addf %28, %29 : vector<3x1xf32>
    %31 = math.rsqrt %30 : vector<3x1xf32>
    %32 = vector.broadcast %31 : vector<3x1xf32> to vector<3x32xf32>
    %33 = arith.mulf %2, %32 : vector<3x32xf32>
    %cst_18 = arith.constant dense<0.000000e+00> : vector<2x1xf32>
    %34 = tpu.matmul %25, %17, %cst_18 {dimension_numbers = #tpu.dot_dimension_numbers<[1], [1], [0], [0], [0, 0, 1, 0], [], []>} : vector<2x32xf32>, vector<1x32xf32>, vector<2x1xf32> -> vector<2x1xf32>
    %cst_19 = arith.constant 1.000000e+01 : f32
    %35 = vector.broadcast %cst_19 : f32 to vector<2x1xf32>
    %36 = arith.mulf %34, %35 : vector<2x1xf32>
    %cst_20 = arith.constant dense<0.000000e+00> : vector<3x1xf32>
    %37 = tpu.matmul %33, %17, %cst_20 {dimension_numbers = #tpu.dot_dimension_numbers<[1], [1], [0], [0], [0, 0, 1, 0], [], []>} : vector<3x32xf32>, vector<1x32xf32>, vector<3x1xf32> -> vector<3x1xf32>
    %cst_21 = arith.constant 1.000000e+01 : f32
    %38 = vector.broadcast %cst_21 : f32 to vector<3x1xf32>
    %39 = arith.mulf %37, %38 : vector<3x1xf32>
    %40 = vector.shape_cast %36 : vector<2x1xf32> to vector<1x2x1xf32>
    %cst_22 = arith.constant dense<0xFF800000> : vector<1xf32>
    %41 = vector.multi_reduction <maximumf>, %40, %cst_22 [1, 2] : vector<1x2x1xf32> to vector<1xf32>
    %42 = vector.shape_cast %41 : vector<1xf32> to vector<1x1x1xf32>
    %43 = vector.extract %42[0, 0, 0] : f32 from vector<1x1x1xf32>
    %44 = vector.shape_cast %39 : vector<3x1xf32> to vector<1x3x1xf32>
    %cst_23 = arith.constant dense<0xFF800000> : vector<1xf32>
    %45 = vector.multi_reduction <maximumf>, %44, %cst_23 [1, 2] : vector<1x3x1xf32> to vector<1xf32>
    %46 = vector.shape_cast %45 : vector<1xf32> to vector<1x1x1xf32>
    %47 = vector.extract %46[0, 0, 0] : f32 from vector<1x1x1xf32>
    %48 = arith.maximumf %43, %47 : f32
    %49 = vector.broadcast %48 : f32 to vector<2x1xf32>
    %50 = arith.subf %36, %49 : vector<2x1xf32>
    %51 = math.exp %50 : vector<2x1xf32>
    %52 = vector.shape_cast %51 : vector<2x1xf32> to vector<1x2x1xf32>
    %cst_24 = arith.constant dense<0.000000e+00> : vector<1xf32>
    %53 = vector.multi_reduction <add>, %52, %cst_24 [1, 2] : vector<1x2x1xf32> to vector<1xf32>
    %54 = vector.shape_cast %53 : vector<1xf32> to vector<1x1x1xf32>
    %55 = vector.extract %54[0, 0, 0] : f32 from vector<1x1x1xf32>
    %56 = vector.broadcast %48 : f32 to vector<3x1xf32>
    %57 = arith.subf %39, %56 : vector<3x1xf32>
    %58 = math.exp %57 : vector<3x1xf32>
    %59 = arith.mulf %3, %58 : vector<3x1xf32>
    %60 = vector.shape_cast %59 : vector<3x1xf32> to vector<1x3x1xf32>
    %cst_25 = arith.constant dense<0.000000e+00> : vector<1xf32>
    %61 = vector.multi_reduction <add>, %60, %cst_25 [1, 2] : vector<1x3x1xf32> to vector<1xf32>
    %62 = vector.shape_cast %61 : vector<1xf32> to vector<1x1x1xf32>
    %63 = vector.extract %62[0, 0, 0] : f32 from vector<1x1x1xf32>
    %cst_26 = arith.constant 9.99999996E-13 : f32
    %64 = arith.addf %55, %cst_26 : f32
    %65 = math.log %64 : f32
    %66 = arith.addf %55, %63 : f32
    %cst_27 = arith.constant 9.99999996E-13 : f32
    %67 = arith.addf %66, %cst_27 : f32
    %68 = math.log %67 : f32
    %69 = arith.subf %65, %68 : f32
    %cst_28 = arith.constant 0.000000e+00 : f32
    %70 = arith.subf %cst_28, %69 : f32
    %71 = arith.mulf %4, %4 : vector<8x32xf32>
    %cst_29 = arith.constant dense<0.000000e+00> : vector<8xf32>
    %72 = vector.multi_reduction <add>, %71, %cst_29 [1] : vector<8x32xf32> to vector<8xf32>
    %73 = vector.shape_cast %72 : vector<8xf32> to vector<8x1xf32>
    %74 = arith.mulf %0, %0 : vector<8x32xf32>
    %cst_30 = arith.constant dense<0.000000e+00> : vector<8xf32>
    %75 = vector.multi_reduction <add>, %74, %cst_30 [1] : vector<8x32xf32> to vector<8xf32>
    %76 = vector.shape_cast %75 : vector<8xf32> to vector<8x1xf32>
    %cst_31 = arith.constant dense<0.000000e+00> : vector<8x8xf32>
    %77 = tpu.matmul %4, %0, %cst_31 {dimension_numbers = #tpu.dot_dimension_numbers<[1], [1], [0], [0], [0, 0, 1, 0], [], []>} : vector<8x32xf32>, vector<8x32xf32>, vector<8x8xf32> -> vector<8x8xf32>
    %78 = tpu.transpose %76, [1, 0] : vector<8x1xf32> -> vector<1x8xf32>
    %79 = vector.broadcast %73 : vector<8x1xf32> to vector<8x8xf32>
    %80 = vector.broadcast %78 : vector<1x8xf32> to vector<8x8xf32>
    %81 = arith.addf %79, %80 : vector<8x8xf32>
    %cst_32 = arith.constant 2.000000e+00 : f32
    %82 = vector.broadcast %cst_32 : f32 to vector<8x8xf32>
    %83 = arith.mulf %82, %77 : vector<8x8xf32>
    %84 = arith.subf %81, %83 : vector<8x8xf32>
    %cst_33 = arith.constant 1.000000e+01 : f32
    %85 = vector.broadcast %cst_33 : f32 to vector<8x8xf32>
    %86 = arith.mulf %84, %85 : vector<8x8xf32>
    %cst_34 = arith.constant 8.000000e+00 : f32
    %87 = math.log %cst_34 : f32
    %cst_35 = arith.constant 0.000000e+00 : f32
    %88 = arith.subf %cst_35, %87 : f32
    %cst_36 = arith.constant 8.000000e+00 : f32
    %89 = math.log %cst_36 : f32
    %cst_37 = arith.constant 0.000000e+00 : f32
    %90 = arith.subf %cst_37, %89 : f32
    %cst_38 = arith.constant 0.000000e+00 : f32
    %91 = vector.broadcast %cst_38 : f32 to vector<8x1xf32>
    %cst_39 = arith.constant 0.000000e+00 : f32
    %92 = vector.broadcast %cst_39 : f32 to vector<1x8xf32>
    %c0_i32 = arith.constant 0 : i32
    %93 = vector.broadcast %92 : vector<1x8xf32> to vector<8x8xf32>
    %94 = arith.subf %93, %86 : vector<8x8xf32>
    %cst_40 = arith.constant dense<0xFF800000> : vector<8xf32>
    %95 = vector.multi_reduction <maximumf>, %94, %cst_40 [1] : vector<8x8xf32> to vector<8xf32>
    %96 = vector.shape_cast %95 : vector<8xf32> to vector<8x1xf32>
    %97 = vector.broadcast %96 : vector<8x1xf32> to vector<8x8xf32>
    %98 = arith.subf %94, %97 : vector<8x8xf32>
    %99 = math.exp %98 : vector<8x8xf32>
    %cst_41 = arith.constant dense<0.000000e+00> : vector<8xf32>
    %100 = vector.multi_reduction <add>, %99, %cst_41 [1] : vector<8x8xf32> to vector<8xf32>
    %101 = vector.shape_cast %100 : vector<8xf32> to vector<8x1xf32>
    %102 = math.log %101 : vector<8x1xf32>
    %103 = arith.addf %96, %102 : vector<8x1xf32>
    %104 = vector.broadcast %88 : f32 to vector<8x1xf32>
    %105 = arith.subf %104, %103 : vector<8x1xf32>
    %106 = vector.broadcast %105 : vector<8x1xf32> to vector<8x8xf32>
    %107 = arith.subf %106, %86 : vector<8x8xf32>
    %cst_42 = arith.constant dense<0xFF800000> : vector<8xf32>
    %108 = vector.multi_reduction <maximumf>, %107, %cst_42 [0] : vector<8x8xf32> to vector<8xf32>
    %109 = vector.shape_cast %108 : vector<8xf32> to vector<1x8xf32>
    %110 = vector.broadcast %109 : vector<1x8xf32> to vector<8x8xf32>
    %111 = arith.subf %107, %110 : vector<8x8xf32>
    %112 = math.exp %111 : vector<8x8xf32>
    %cst_43 = arith.constant dense<0.000000e+00> : vector<8xf32>
    %113 = vector.multi_reduction <add>, %112, %cst_43 [0] : vector<8x8xf32> to vector<8xf32>
    %114 = vector.shape_cast %113 : vector<8xf32> to vector<1x8xf32>
    %115 = math.log %114 : vector<1x8xf32>
    %116 = arith.addf %109, %115 : vector<1x8xf32>
    %117 = vector.broadcast %90 : f32 to vector<1x8xf32>
    %118 = arith.subf %117, %116 : vector<1x8xf32>
    %c1_i32 = arith.constant 1 : i32
    %119 = vector.broadcast %118 : vector<1x8xf32> to vector<8x8xf32>
    %120 = arith.subf %119, %86 : vector<8x8xf32>
    %cst_44 = arith.constant dense<0xFF800000> : vector<8xf32>
    %121 = vector.multi_reduction <maximumf>, %120, %cst_44 [1] : vector<8x8xf32> to vector<8xf32>
    %122 = vector.shape_cast %121 : vector<8xf32> to vector<8x1xf32>
    %123 = vector.broadcast %122 : vector<8x1xf32> to vector<8x8xf32>
    %124 = arith.subf %120, %123 : vector<8x8xf32>
    %125 = math.exp %124 : vector<8x8xf32>
    %cst_45 = arith.constant dense<0.000000e+00> : vector<8xf32>
    %126 = vector.multi_reduction <add>, %125, %cst_45 [1] : vector<8x8xf32> to vector<8xf32>
    %127 = vector.shape_cast %126 : vector<8xf32> to vector<8x1xf32>
    %128 = math.log %127 : vector<8x1xf32>
    %129 = arith.addf %122, %128 : vector<8x1xf32>
    %130 = vector.broadcast %88 : f32 to vector<8x1xf32>
    %131 = arith.subf %130, %129 : vector<8x1xf32>
    %132 = vector.broadcast %131 : vector<8x1xf32> to vector<8x8xf32>
    %133 = arith.subf %132, %86 : vector<8x8xf32>
    %cst_46 = arith.constant dense<0xFF800000> : vector<8xf32>
    %134 = vector.multi_reduction <maximumf>, %133, %cst_46 [0] : vector<8x8xf32> to vector<8xf32>
    %135 = vector.shape_cast %134 : vector<8xf32> to vector<1x8xf32>
    %136 = vector.broadcast %135 : vector<1x8xf32> to vector<8x8xf32>
    %137 = arith.subf %133, %136 : vector<8x8xf32>
    %138 = math.exp %137 : vector<8x8xf32>
    %cst_47 = arith.constant dense<0.000000e+00> : vector<8xf32>
    %139 = vector.multi_reduction <add>, %138, %cst_47 [0] : vector<8x8xf32> to vector<8xf32>
    %140 = vector.shape_cast %139 : vector<8xf32> to vector<1x8xf32>
    %141 = math.log %140 : vector<1x8xf32>
    %142 = arith.addf %135, %141 : vector<1x8xf32>
    %143 = vector.broadcast %90 : f32 to vector<1x8xf32>
    %144 = arith.subf %143, %142 : vector<1x8xf32>
    %c2_i32 = arith.constant 2 : i32
    %145 = vector.broadcast %144 : vector<1x8xf32> to vector<8x8xf32>
    %146 = arith.subf %145, %86 : vector<8x8xf32>
    %cst_48 = arith.constant dense<0xFF800000> : vector<8xf32>
    %147 = vector.multi_reduction <maximumf>, %146, %cst_48 [1] : vector<8x8xf32> to vector<8xf32>
    %148 = vector.shape_cast %147 : vector<8xf32> to vector<8x1xf32>
    %149 = vector.broadcast %148 : vector<8x1xf32> to vector<8x8xf32>
    %150 = arith.subf %146, %149 : vector<8x8xf32>
    %151 = math.exp %150 : vector<8x8xf32>
    %cst_49 = arith.constant dense<0.000000e+00> : vector<8xf32>
    %152 = vector.multi_reduction <add>, %151, %cst_49 [1] : vector<8x8xf32> to vector<8xf32>
    %153 = vector.shape_cast %152 : vector<8xf32> to vector<8x1xf32>
    %154 = math.log %153 : vector<8x1xf32>
    %155 = arith.addf %148, %154 : vector<8x1xf32>
    %156 = vector.broadcast %88 : f32 to vector<8x1xf32>
    %157 = arith.subf %156, %155 : vector<8x1xf32>
    %158 = vector.broadcast %157 : vector<8x1xf32> to vector<8x8xf32>
    %159 = arith.subf %158, %86 : vector<8x8xf32>
    %cst_50 = arith.constant dense<0xFF800000> : vector<8xf32>
    %160 = vector.multi_reduction <maximumf>, %159, %cst_50 [0] : vector<8x8xf32> to vector<8xf32>
    %161 = vector.shape_cast %160 : vector<8xf32> to vector<1x8xf32>
    %162 = vector.broadcast %161 : vector<1x8xf32> to vector<8x8xf32>
    %163 = arith.subf %159, %162 : vector<8x8xf32>
    %164 = math.exp %163 : vector<8x8xf32>
    %cst_51 = arith.constant dense<0.000000e+00> : vector<8xf32>
    %165 = vector.multi_reduction <add>, %164, %cst_51 [0] : vector<8x8xf32> to vector<8xf32>
    %166 = vector.shape_cast %165 : vector<8xf32> to vector<1x8xf32>
    %167 = math.log %166 : vector<1x8xf32>
    %168 = arith.addf %161, %167 : vector<1x8xf32>
    %169 = vector.broadcast %90 : f32 to vector<1x8xf32>
    %170 = arith.subf %169, %168 : vector<1x8xf32>
    %c3_i32 = arith.constant 3 : i32
    %171 = vector.broadcast %170 : vector<1x8xf32> to vector<8x8xf32>
    %172 = arith.subf %171, %86 : vector<8x8xf32>
    %cst_52 = arith.constant dense<0xFF800000> : vector<8xf32>
    %173 = vector.multi_reduction <maximumf>, %172, %cst_52 [1] : vector<8x8xf32> to vector<8xf32>
    %174 = vector.shape_cast %173 : vector<8xf32> to vector<8x1xf32>
    %175 = vector.broadcast %174 : vector<8x1xf32> to vector<8x8xf32>
    %176 = arith.subf %172, %175 : vector<8x8xf32>
    %177 = math.exp %176 : vector<8x8xf32>
    %cst_53 = arith.constant dense<0.000000e+00> : vector<8xf32>
    %178 = vector.multi_reduction <add>, %177, %cst_53 [1] : vector<8x8xf32> to vector<8xf32>
    %179 = vector.shape_cast %178 : vector<8xf32> to vector<8x1xf32>
    %180 = math.log %179 : vector<8x1xf32>
    %181 = arith.addf %174, %180 : vector<8x1xf32>
    %182 = vector.broadcast %88 : f32 to vector<8x1xf32>
    %183 = arith.subf %182, %181 : vector<8x1xf32>
    %184 = vector.broadcast %183 : vector<8x1xf32> to vector<8x8xf32>
    %185 = arith.subf %184, %86 : vector<8x8xf32>
    %cst_54 = arith.constant dense<0xFF800000> : vector<8xf32>
    %186 = vector.multi_reduction <maximumf>, %185, %cst_54 [0] : vector<8x8xf32> to vector<8xf32>
    %187 = vector.shape_cast %186 : vector<8xf32> to vector<1x8xf32>
    %188 = vector.broadcast %187 : vector<1x8xf32> to vector<8x8xf32>
    %189 = arith.subf %185, %188 : vector<8x8xf32>
    %190 = math.exp %189 : vector<8x8xf32>
    %cst_55 = arith.constant dense<0.000000e+00> : vector<8xf32>
    %191 = vector.multi_reduction <add>, %190, %cst_55 [0] : vector<8x8xf32> to vector<8xf32>
    %192 = vector.shape_cast %191 : vector<8xf32> to vector<1x8xf32>
    %193 = math.log %192 : vector<1x8xf32>
    %194 = arith.addf %187, %193 : vector<1x8xf32>
    %195 = vector.broadcast %90 : f32 to vector<1x8xf32>
    %196 = arith.subf %195, %194 : vector<1x8xf32>
    %c4_i32 = arith.constant 4 : i32
    %197 = vector.broadcast %196 : vector<1x8xf32> to vector<8x8xf32>
    %198 = arith.subf %197, %86 : vector<8x8xf32>
    %cst_56 = arith.constant dense<0xFF800000> : vector<8xf32>
    %199 = vector.multi_reduction <maximumf>, %198, %cst_56 [1] : vector<8x8xf32> to vector<8xf32>
    %200 = vector.shape_cast %199 : vector<8xf32> to vector<8x1xf32>
    %201 = vector.broadcast %200 : vector<8x1xf32> to vector<8x8xf32>
    %202 = arith.subf %198, %201 : vector<8x8xf32>
    %203 = math.exp %202 : vector<8x8xf32>
    %cst_57 = arith.constant dense<0.000000e+00> : vector<8xf32>
    %204 = vector.multi_reduction <add>, %203, %cst_57 [1] : vector<8x8xf32> to vector<8xf32>
    %205 = vector.shape_cast %204 : vector<8xf32> to vector<8x1xf32>
    %206 = math.log %205 : vector<8x1xf32>
    %207 = arith.addf %200, %206 : vector<8x1xf32>
    %208 = vector.broadcast %88 : f32 to vector<8x1xf32>
    %209 = arith.subf %208, %207 : vector<8x1xf32>
    %210 = vector.broadcast %209 : vector<8x1xf32> to vector<8x8xf32>
    %211 = arith.subf %210, %86 : vector<8x8xf32>
    %cst_58 = arith.constant dense<0xFF800000> : vector<8xf32>
    %212 = vector.multi_reduction <maximumf>, %211, %cst_58 [0] : vector<8x8xf32> to vector<8xf32>
    %213 = vector.shape_cast %212 : vector<8xf32> to vector<1x8xf32>
    %214 = vector.broadcast %213 : vector<1x8xf32> to vector<8x8xf32>
    %215 = arith.subf %211, %214 : vector<8x8xf32>
    %216 = math.exp %215 : vector<8x8xf32>
    %cst_59 = arith.constant dense<0.000000e+00> : vector<8xf32>
    %217 = vector.multi_reduction <add>, %216, %cst_59 [0] : vector<8x8xf32> to vector<8xf32>
    %218 = vector.shape_cast %217 : vector<8xf32> to vector<1x8xf32>
    %219 = math.log %218 : vector<1x8xf32>
    %220 = arith.addf %213, %219 : vector<1x8xf32>
    %221 = vector.broadcast %90 : f32 to vector<1x8xf32>
    %222 = arith.subf %221, %220 : vector<1x8xf32>
    %c5_i32 = arith.constant 5 : i32
    %223 = vector.broadcast %222 : vector<1x8xf32> to vector<8x8xf32>
    %224 = arith.subf %223, %86 : vector<8x8xf32>
    %cst_60 = arith.constant dense<0xFF800000> : vector<8xf32>
    %225 = vector.multi_reduction <maximumf>, %224, %cst_60 [1] : vector<8x8xf32> to vector<8xf32>
    %226 = vector.shape_cast %225 : vector<8xf32> to vector<8x1xf32>
    %227 = vector.broadcast %226 : vector<8x1xf32> to vector<8x8xf32>
    %228 = arith.subf %224, %227 : vector<8x8xf32>
    %229 = math.exp %228 : vector<8x8xf32>
    %cst_61 = arith.constant dense<0.000000e+00> : vector<8xf32>
    %230 = vector.multi_reduction <add>, %229, %cst_61 [1] : vector<8x8xf32> to vector<8xf32>
    %231 = vector.shape_cast %230 : vector<8xf32> to vector<8x1xf32>
    %232 = math.log %231 : vector<8x1xf32>
    %233 = arith.addf %226, %232 : vector<8x1xf32>
    %234 = vector.broadcast %88 : f32 to vector<8x1xf32>
    %235 = arith.subf %234, %233 : vector<8x1xf32>
    %236 = vector.broadcast %235 : vector<8x1xf32> to vector<8x8xf32>
    %237 = arith.subf %236, %86 : vector<8x8xf32>
    %cst_62 = arith.constant dense<0xFF800000> : vector<8xf32>
    %238 = vector.multi_reduction <maximumf>, %237, %cst_62 [0] : vector<8x8xf32> to vector<8xf32>
    %239 = vector.shape_cast %238 : vector<8xf32> to vector<1x8xf32>
    %240 = vector.broadcast %239 : vector<1x8xf32> to vector<8x8xf32>
    %241 = arith.subf %237, %240 : vector<8x8xf32>
    %242 = math.exp %241 : vector<8x8xf32>
    %cst_63 = arith.constant dense<0.000000e+00> : vector<8xf32>
    %243 = vector.multi_reduction <add>, %242, %cst_63 [0] : vector<8x8xf32> to vector<8xf32>
    %244 = vector.shape_cast %243 : vector<8xf32> to vector<1x8xf32>
    %245 = math.log %244 : vector<1x8xf32>
    %246 = arith.addf %239, %245 : vector<1x8xf32>
    %247 = vector.broadcast %90 : f32 to vector<1x8xf32>
    %248 = arith.subf %247, %246 : vector<1x8xf32>
    %c6_i32 = arith.constant 6 : i32
    %249 = vector.broadcast %248 : vector<1x8xf32> to vector<8x8xf32>
    %250 = arith.subf %249, %86 : vector<8x8xf32>
    %cst_64 = arith.constant dense<0xFF800000> : vector<8xf32>
    %251 = vector.multi_reduction <maximumf>, %250, %cst_64 [1] : vector<8x8xf32> to vector<8xf32>
    %252 = vector.shape_cast %251 : vector<8xf32> to vector<8x1xf32>
    %253 = vector.broadcast %252 : vector<8x1xf32> to vector<8x8xf32>
    %254 = arith.subf %250, %253 : vector<8x8xf32>
    %255 = math.exp %254 : vector<8x8xf32>
    %cst_65 = arith.constant dense<0.000000e+00> : vector<8xf32>
    %256 = vector.multi_reduction <add>, %255, %cst_65 [1] : vector<8x8xf32> to vector<8xf32>
    %257 = vector.shape_cast %256 : vector<8xf32> to vector<8x1xf32>
    %258 = math.log %257 : vector<8x1xf32>
    %259 = arith.addf %252, %258 : vector<8x1xf32>
    %260 = vector.broadcast %88 : f32 to vector<8x1xf32>
    %261 = arith.subf %260, %259 : vector<8x1xf32>
    %262 = vector.broadcast %261 : vector<8x1xf32> to vector<8x8xf32>
    %263 = arith.subf %262, %86 : vector<8x8xf32>
    %cst_66 = arith.constant dense<0xFF800000> : vector<8xf32>
    %264 = vector.multi_reduction <maximumf>, %263, %cst_66 [0] : vector<8x8xf32> to vector<8xf32>
    %265 = vector.shape_cast %264 : vector<8xf32> to vector<1x8xf32>
    %266 = vector.broadcast %265 : vector<1x8xf32> to vector<8x8xf32>
    %267 = arith.subf %263, %266 : vector<8x8xf32>
    %268 = math.exp %267 : vector<8x8xf32>
    %cst_67 = arith.constant dense<0.000000e+00> : vector<8xf32>
    %269 = vector.multi_reduction <add>, %268, %cst_67 [0] : vector<8x8xf32> to vector<8xf32>
    %270 = vector.shape_cast %269 : vector<8xf32> to vector<1x8xf32>
    %271 = math.log %270 : vector<1x8xf32>
    %272 = arith.addf %265, %271 : vector<1x8xf32>
    %273 = vector.broadcast %90 : f32 to vector<1x8xf32>
    %274 = arith.subf %273, %272 : vector<1x8xf32>
    %c7_i32 = arith.constant 7 : i32
    %275 = vector.broadcast %274 : vector<1x8xf32> to vector<8x8xf32>
    %276 = arith.subf %275, %86 : vector<8x8xf32>
    %cst_68 = arith.constant dense<0xFF800000> : vector<8xf32>
    %277 = vector.multi_reduction <maximumf>, %276, %cst_68 [1] : vector<8x8xf32> to vector<8xf32>
    %278 = vector.shape_cast %277 : vector<8xf32> to vector<8x1xf32>
    %279 = vector.broadcast %278 : vector<8x1xf32> to vector<8x8xf32>
    %280 = arith.subf %276, %279 : vector<8x8xf32>
    %281 = math.exp %280 : vector<8x8xf32>
    %cst_69 = arith.constant dense<0.000000e+00> : vector<8xf32>
    %282 = vector.multi_reduction <add>, %281, %cst_69 [1] : vector<8x8xf32> to vector<8xf32>
    %283 = vector.shape_cast %282 : vector<8xf32> to vector<8x1xf32>
    %284 = math.log %283 : vector<8x1xf32>
    %285 = arith.addf %278, %284 : vector<8x1xf32>
    %286 = vector.broadcast %88 : f32 to vector<8x1xf32>
    %287 = arith.subf %286, %285 : vector<8x1xf32>
    %288 = vector.broadcast %287 : vector<8x1xf32> to vector<8x8xf32>
    %289 = arith.subf %288, %86 : vector<8x8xf32>
    %cst_70 = arith.constant dense<0xFF800000> : vector<8xf32>
    %290 = vector.multi_reduction <maximumf>, %289, %cst_70 [0] : vector<8x8xf32> to vector<8xf32>
    %291 = vector.shape_cast %290 : vector<8xf32> to vector<1x8xf32>
    %292 = vector.broadcast %291 : vector<1x8xf32> to vector<8x8xf32>
    %293 = arith.subf %289, %292 : vector<8x8xf32>
    %294 = math.exp %293 : vector<8x8xf32>
    %cst_71 = arith.constant dense<0.000000e+00> : vector<8xf32>
    %295 = vector.multi_reduction <add>, %294, %cst_71 [0] : vector<8x8xf32> to vector<8xf32>
    %296 = vector.shape_cast %295 : vector<8xf32> to vector<1x8xf32>
    %297 = math.log %296 : vector<1x8xf32>
    %298 = arith.addf %291, %297 : vector<1x8xf32>
    %299 = vector.broadcast %90 : f32 to vector<1x8xf32>
    %300 = arith.subf %299, %298 : vector<1x8xf32>
    %c8_i32 = arith.constant 8 : i32
    %301 = vector.broadcast %300 : vector<1x8xf32> to vector<8x8xf32>
    %302 = arith.subf %301, %86 : vector<8x8xf32>
    %cst_72 = arith.constant dense<0xFF800000> : vector<8xf32>
    %303 = vector.multi_reduction <maximumf>, %302, %cst_72 [1] : vector<8x8xf32> to vector<8xf32>
    %304 = vector.shape_cast %303 : vector<8xf32> to vector<8x1xf32>
    %305 = vector.broadcast %304 : vector<8x1xf32> to vector<8x8xf32>
    %306 = arith.subf %302, %305 : vector<8x8xf32>
    %307 = math.exp %306 : vector<8x8xf32>
    %cst_73 = arith.constant dense<0.000000e+00> : vector<8xf32>
    %308 = vector.multi_reduction <add>, %307, %cst_73 [1] : vector<8x8xf32> to vector<8xf32>
    %309 = vector.shape_cast %308 : vector<8xf32> to vector<8x1xf32>
    %310 = math.log %309 : vector<8x1xf32>
    %311 = arith.addf %304, %310 : vector<8x1xf32>
    %312 = vector.broadcast %88 : f32 to vector<8x1xf32>
    %313 = arith.subf %312, %311 : vector<8x1xf32>
    %314 = vector.broadcast %313 : vector<8x1xf32> to vector<8x8xf32>
    %315 = arith.subf %314, %86 : vector<8x8xf32>
    %cst_74 = arith.constant dense<0xFF800000> : vector<8xf32>
    %316 = vector.multi_reduction <maximumf>, %315, %cst_74 [0] : vector<8x8xf32> to vector<8xf32>
    %317 = vector.shape_cast %316 : vector<8xf32> to vector<1x8xf32>
    %318 = vector.broadcast %317 : vector<1x8xf32> to vector<8x8xf32>
    %319 = arith.subf %315, %318 : vector<8x8xf32>
    %320 = math.exp %319 : vector<8x8xf32>
    %cst_75 = arith.constant dense<0.000000e+00> : vector<8xf32>
    %321 = vector.multi_reduction <add>, %320, %cst_75 [0] : vector<8x8xf32> to vector<8xf32>
    %322 = vector.shape_cast %321 : vector<8xf32> to vector<1x8xf32>
    %323 = math.log %322 : vector<1x8xf32>
    %324 = arith.addf %317, %323 : vector<1x8xf32>
    %325 = vector.broadcast %90 : f32 to vector<1x8xf32>
    %326 = arith.subf %325, %324 : vector<1x8xf32>
    %c9_i32 = arith.constant 9 : i32
    %327 = vector.broadcast %326 : vector<1x8xf32> to vector<8x8xf32>
    %328 = arith.subf %327, %86 : vector<8x8xf32>
    %cst_76 = arith.constant dense<0xFF800000> : vector<8xf32>
    %329 = vector.multi_reduction <maximumf>, %328, %cst_76 [1] : vector<8x8xf32> to vector<8xf32>
    %330 = vector.shape_cast %329 : vector<8xf32> to vector<8x1xf32>
    %331 = vector.broadcast %330 : vector<8x1xf32> to vector<8x8xf32>
    %332 = arith.subf %328, %331 : vector<8x8xf32>
    %333 = math.exp %332 : vector<8x8xf32>
    %cst_77 = arith.constant dense<0.000000e+00> : vector<8xf32>
    %334 = vector.multi_reduction <add>, %333, %cst_77 [1] : vector<8x8xf32> to vector<8xf32>
    %335 = vector.shape_cast %334 : vector<8xf32> to vector<8x1xf32>
    %336 = math.log %335 : vector<8x1xf32>
    %337 = arith.addf %330, %336 : vector<8x1xf32>
    %338 = vector.broadcast %88 : f32 to vector<8x1xf32>
    %339 = arith.subf %338, %337 : vector<8x1xf32>
    %340 = vector.broadcast %339 : vector<8x1xf32> to vector<8x8xf32>
    %341 = arith.subf %340, %86 : vector<8x8xf32>
    %cst_78 = arith.constant dense<0xFF800000> : vector<8xf32>
    %342 = vector.multi_reduction <maximumf>, %341, %cst_78 [0] : vector<8x8xf32> to vector<8xf32>
    %343 = vector.shape_cast %342 : vector<8xf32> to vector<1x8xf32>
    %344 = vector.broadcast %343 : vector<1x8xf32> to vector<8x8xf32>
    %345 = arith.subf %341, %344 : vector<8x8xf32>
    %346 = math.exp %345 : vector<8x8xf32>
    %cst_79 = arith.constant dense<0.000000e+00> : vector<8xf32>
    %347 = vector.multi_reduction <add>, %346, %cst_79 [0] : vector<8x8xf32> to vector<8xf32>
    %348 = vector.shape_cast %347 : vector<8xf32> to vector<1x8xf32>
    %349 = math.log %348 : vector<1x8xf32>
    %350 = arith.addf %343, %349 : vector<1x8xf32>
    %351 = vector.broadcast %90 : f32 to vector<1x8xf32>
    %352 = arith.subf %351, %350 : vector<1x8xf32>
    %c10_i32 = arith.constant 10 : i32
    %353 = vector.broadcast %352 : vector<1x8xf32> to vector<8x8xf32>
    %354 = arith.subf %353, %86 : vector<8x8xf32>
    %cst_80 = arith.constant dense<0xFF800000> : vector<8xf32>
    %355 = vector.multi_reduction <maximumf>, %354, %cst_80 [1] : vector<8x8xf32> to vector<8xf32>
    %356 = vector.shape_cast %355 : vector<8xf32> to vector<8x1xf32>
    %357 = vector.broadcast %356 : vector<8x1xf32> to vector<8x8xf32>
    %358 = arith.subf %354, %357 : vector<8x8xf32>
    %359 = math.exp %358 : vector<8x8xf32>
    %cst_81 = arith.constant dense<0.000000e+00> : vector<8xf32>
    %360 = vector.multi_reduction <add>, %359, %cst_81 [1] : vector<8x8xf32> to vector<8xf32>
    %361 = vector.shape_cast %360 : vector<8xf32> to vector<8x1xf32>
    %362 = math.log %361 : vector<8x1xf32>
    %363 = arith.addf %356, %362 : vector<8x1xf32>
    %364 = vector.broadcast %88 : f32 to vector<8x1xf32>
    %365 = arith.subf %364, %363 : vector<8x1xf32>
    %366 = vector.broadcast %365 : vector<8x1xf32> to vector<8x8xf32>
    %367 = arith.subf %366, %86 : vector<8x8xf32>
    %cst_82 = arith.constant dense<0xFF800000> : vector<8xf32>
    %368 = vector.multi_reduction <maximumf>, %367, %cst_82 [0] : vector<8x8xf32> to vector<8xf32>
    %369 = vector.shape_cast %368 : vector<8xf32> to vector<1x8xf32>
    %370 = vector.broadcast %369 : vector<1x8xf32> to vector<8x8xf32>
    %371 = arith.subf %367, %370 : vector<8x8xf32>
    %372 = math.exp %371 : vector<8x8xf32>
    %cst_83 = arith.constant dense<0.000000e+00> : vector<8xf32>
    %373 = vector.multi_reduction <add>, %372, %cst_83 [0] : vector<8x8xf32> to vector<8xf32>
    %374 = vector.shape_cast %373 : vector<8xf32> to vector<1x8xf32>
    %375 = math.log %374 : vector<1x8xf32>
    %376 = arith.addf %369, %375 : vector<1x8xf32>
    %377 = vector.broadcast %90 : f32 to vector<1x8xf32>
    %378 = arith.subf %377, %376 : vector<1x8xf32>
    %c11_i32 = arith.constant 11 : i32
    %379 = vector.broadcast %378 : vector<1x8xf32> to vector<8x8xf32>
    %380 = arith.subf %379, %86 : vector<8x8xf32>
    %cst_84 = arith.constant dense<0xFF800000> : vector<8xf32>
    %381 = vector.multi_reduction <maximumf>, %380, %cst_84 [1] : vector<8x8xf32> to vector<8xf32>
    %382 = vector.shape_cast %381 : vector<8xf32> to vector<8x1xf32>
    %383 = vector.broadcast %382 : vector<8x1xf32> to vector<8x8xf32>
    %384 = arith.subf %380, %383 : vector<8x8xf32>
    %385 = math.exp %384 : vector<8x8xf32>
    %cst_85 = arith.constant dense<0.000000e+00> : vector<8xf32>
    %386 = vector.multi_reduction <add>, %385, %cst_85 [1] : vector<8x8xf32> to vector<8xf32>
    %387 = vector.shape_cast %386 : vector<8xf32> to vector<8x1xf32>
    %388 = math.log %387 : vector<8x1xf32>
    %389 = arith.addf %382, %388 : vector<8x1xf32>
    %390 = vector.broadcast %88 : f32 to vector<8x1xf32>
    %391 = arith.subf %390, %389 : vector<8x1xf32>
    %392 = vector.broadcast %391 : vector<8x1xf32> to vector<8x8xf32>
    %393 = arith.subf %392, %86 : vector<8x8xf32>
    %cst_86 = arith.constant dense<0xFF800000> : vector<8xf32>
    %394 = vector.multi_reduction <maximumf>, %393, %cst_86 [0] : vector<8x8xf32> to vector<8xf32>
    %395 = vector.shape_cast %394 : vector<8xf32> to vector<1x8xf32>
    %396 = vector.broadcast %395 : vector<1x8xf32> to vector<8x8xf32>
    %397 = arith.subf %393, %396 : vector<8x8xf32>
    %398 = math.exp %397 : vector<8x8xf32>
    %cst_87 = arith.constant dense<0.000000e+00> : vector<8xf32>
    %399 = vector.multi_reduction <add>, %398, %cst_87 [0] : vector<8x8xf32> to vector<8xf32>
    %400 = vector.shape_cast %399 : vector<8xf32> to vector<1x8xf32>
    %401 = math.log %400 : vector<1x8xf32>
    %402 = arith.addf %395, %401 : vector<1x8xf32>
    %403 = vector.broadcast %90 : f32 to vector<1x8xf32>
    %404 = arith.subf %403, %402 : vector<1x8xf32>
    %c12_i32 = arith.constant 12 : i32
    %405 = vector.broadcast %404 : vector<1x8xf32> to vector<8x8xf32>
    %406 = arith.subf %405, %86 : vector<8x8xf32>
    %cst_88 = arith.constant dense<0xFF800000> : vector<8xf32>
    %407 = vector.multi_reduction <maximumf>, %406, %cst_88 [1] : vector<8x8xf32> to vector<8xf32>
    %408 = vector.shape_cast %407 : vector<8xf32> to vector<8x1xf32>
    %409 = vector.broadcast %408 : vector<8x1xf32> to vector<8x8xf32>
    %410 = arith.subf %406, %409 : vector<8x8xf32>
    %411 = math.exp %410 : vector<8x8xf32>
    %cst_89 = arith.constant dense<0.000000e+00> : vector<8xf32>
    %412 = vector.multi_reduction <add>, %411, %cst_89 [1] : vector<8x8xf32> to vector<8xf32>
    %413 = vector.shape_cast %412 : vector<8xf32> to vector<8x1xf32>
    %414 = math.log %413 : vector<8x1xf32>
    %415 = arith.addf %408, %414 : vector<8x1xf32>
    %416 = vector.broadcast %88 : f32 to vector<8x1xf32>
    %417 = arith.subf %416, %415 : vector<8x1xf32>
    %418 = vector.broadcast %417 : vector<8x1xf32> to vector<8x8xf32>
    %419 = arith.subf %418, %86 : vector<8x8xf32>
    %cst_90 = arith.constant dense<0xFF800000> : vector<8xf32>
    %420 = vector.multi_reduction <maximumf>, %419, %cst_90 [0] : vector<8x8xf32> to vector<8xf32>
    %421 = vector.shape_cast %420 : vector<8xf32> to vector<1x8xf32>
    %422 = vector.broadcast %421 : vector<1x8xf32> to vector<8x8xf32>
    %423 = arith.subf %419, %422 : vector<8x8xf32>
    %424 = math.exp %423 : vector<8x8xf32>
    %cst_91 = arith.constant dense<0.000000e+00> : vector<8xf32>
    %425 = vector.multi_reduction <add>, %424, %cst_91 [0] : vector<8x8xf32> to vector<8xf32>
    %426 = vector.shape_cast %425 : vector<8xf32> to vector<1x8xf32>
    %427 = math.log %426 : vector<1x8xf32>
    %428 = arith.addf %421, %427 : vector<1x8xf32>
    %429 = vector.broadcast %90 : f32 to vector<1x8xf32>
    %430 = arith.subf %429, %428 : vector<1x8xf32>
    %c13_i32 = arith.constant 13 : i32
    %431 = vector.broadcast %430 : vector<1x8xf32> to vector<8x8xf32>
    %432 = arith.subf %431, %86 : vector<8x8xf32>
    %cst_92 = arith.constant dense<0xFF800000> : vector<8xf32>
    %433 = vector.multi_reduction <maximumf>, %432, %cst_92 [1] : vector<8x8xf32> to vector<8xf32>
    %434 = vector.shape_cast %433 : vector<8xf32> to vector<8x1xf32>
    %435 = vector.broadcast %434 : vector<8x1xf32> to vector<8x8xf32>
    %436 = arith.subf %432, %435 : vector<8x8xf32>
    %437 = math.exp %436 : vector<8x8xf32>
    %cst_93 = arith.constant dense<0.000000e+00> : vector<8xf32>
    %438 = vector.multi_reduction <add>, %437, %cst_93 [1] : vector<8x8xf32> to vector<8xf32>
    %439 = vector.shape_cast %438 : vector<8xf32> to vector<8x1xf32>
    %440 = math.log %439 : vector<8x1xf32>
    %441 = arith.addf %434, %440 : vector<8x1xf32>
    %442 = vector.broadcast %88 : f32 to vector<8x1xf32>
    %443 = arith.subf %442, %441 : vector<8x1xf32>
    %444 = vector.broadcast %443 : vector<8x1xf32> to vector<8x8xf32>
    %445 = arith.subf %444, %86 : vector<8x8xf32>
    %cst_94 = arith.constant dense<0xFF800000> : vector<8xf32>
    %446 = vector.multi_reduction <maximumf>, %445, %cst_94 [0] : vector<8x8xf32> to vector<8xf32>
    %447 = vector.shape_cast %446 : vector<8xf32> to vector<1x8xf32>
    %448 = vector.broadcast %447 : vector<1x8xf32> to vector<8x8xf32>
    %449 = arith.subf %445, %448 : vector<8x8xf32>
    %450 = math.exp %449 : vector<8x8xf32>
    %cst_95 = arith.constant dense<0.000000e+00> : vector<8xf32>
    %451 = vector.multi_reduction <add>, %450, %cst_95 [0] : vector<8x8xf32> to vector<8xf32>
    %452 = vector.shape_cast %451 : vector<8xf32> to vector<1x8xf32>
    %453 = math.log %452 : vector<1x8xf32>
    %454 = arith.addf %447, %453 : vector<1x8xf32>
    %455 = vector.broadcast %90 : f32 to vector<1x8xf32>
    %456 = arith.subf %455, %454 : vector<1x8xf32>
    %c14_i32 = arith.constant 14 : i32
    %457 = vector.broadcast %456 : vector<1x8xf32> to vector<8x8xf32>
    %458 = arith.subf %457, %86 : vector<8x8xf32>
    %cst_96 = arith.constant dense<0xFF800000> : vector<8xf32>
    %459 = vector.multi_reduction <maximumf>, %458, %cst_96 [1] : vector<8x8xf32> to vector<8xf32>
    %460 = vector.shape_cast %459 : vector<8xf32> to vector<8x1xf32>
    %461 = vector.broadcast %460 : vector<8x1xf32> to vector<8x8xf32>
    %462 = arith.subf %458, %461 : vector<8x8xf32>
    %463 = math.exp %462 : vector<8x8xf32>
    %cst_97 = arith.constant dense<0.000000e+00> : vector<8xf32>
    %464 = vector.multi_reduction <add>, %463, %cst_97 [1] : vector<8x8xf32> to vector<8xf32>
    %465 = vector.shape_cast %464 : vector<8xf32> to vector<8x1xf32>
    %466 = math.log %465 : vector<8x1xf32>
    %467 = arith.addf %460, %466 : vector<8x1xf32>
    %468 = vector.broadcast %88 : f32 to vector<8x1xf32>
    %469 = arith.subf %468, %467 : vector<8x1xf32>
    %470 = vector.broadcast %469 : vector<8x1xf32> to vector<8x8xf32>
    %471 = arith.subf %470, %86 : vector<8x8xf32>
    %cst_98 = arith.constant dense<0xFF800000> : vector<8xf32>
    %472 = vector.multi_reduction <maximumf>, %471, %cst_98 [0] : vector<8x8xf32> to vector<8xf32>
    %473 = vector.shape_cast %472 : vector<8xf32> to vector<1x8xf32>
    %474 = vector.broadcast %473 : vector<1x8xf32> to vector<8x8xf32>
    %475 = arith.subf %471, %474 : vector<8x8xf32>
    %476 = math.exp %475 : vector<8x8xf32>
    %cst_99 = arith.constant dense<0.000000e+00> : vector<8xf32>
    %477 = vector.multi_reduction <add>, %476, %cst_99 [0] : vector<8x8xf32> to vector<8xf32>
    %478 = vector.shape_cast %477 : vector<8xf32> to vector<1x8xf32>
    %479 = math.log %478 : vector<1x8xf32>
    %480 = arith.addf %473, %479 : vector<1x8xf32>
    %481 = vector.broadcast %90 : f32 to vector<1x8xf32>
    %482 = arith.subf %481, %480 : vector<1x8xf32>
    %c15_i32 = arith.constant 15 : i32
    %483 = vector.broadcast %482 : vector<1x8xf32> to vector<8x8xf32>
    %484 = arith.subf %483, %86 : vector<8x8xf32>
    %cst_100 = arith.constant dense<0xFF800000> : vector<8xf32>
    %485 = vector.multi_reduction <maximumf>, %484, %cst_100 [1] : vector<8x8xf32> to vector<8xf32>
    %486 = vector.shape_cast %485 : vector<8xf32> to vector<8x1xf32>
    %487 = vector.broadcast %486 : vector<8x1xf32> to vector<8x8xf32>
    %488 = arith.subf %484, %487 : vector<8x8xf32>
    %489 = math.exp %488 : vector<8x8xf32>
    %cst_101 = arith.constant dense<0.000000e+00> : vector<8xf32>
    %490 = vector.multi_reduction <add>, %489, %cst_101 [1] : vector<8x8xf32> to vector<8xf32>
    %491 = vector.shape_cast %490 : vector<8xf32> to vector<8x1xf32>
    %492 = math.log %491 : vector<8x1xf32>
    %493 = arith.addf %486, %492 : vector<8x1xf32>
    %494 = vector.broadcast %88 : f32 to vector<8x1xf32>
    %495 = arith.subf %494, %493 : vector<8x1xf32>
    %496 = vector.broadcast %495 : vector<8x1xf32> to vector<8x8xf32>
    %497 = arith.subf %496, %86 : vector<8x8xf32>
    %cst_102 = arith.constant dense<0xFF800000> : vector<8xf32>
    %498 = vector.multi_reduction <maximumf>, %497, %cst_102 [0] : vector<8x8xf32> to vector<8xf32>
    %499 = vector.shape_cast %498 : vector<8xf32> to vector<1x8xf32>
    %500 = vector.broadcast %499 : vector<1x8xf32> to vector<8x8xf32>
    %501 = arith.subf %497, %500 : vector<8x8xf32>
    %502 = math.exp %501 : vector<8x8xf32>
    %cst_103 = arith.constant dense<0.000000e+00> : vector<8xf32>
    %503 = vector.multi_reduction <add>, %502, %cst_103 [0] : vector<8x8xf32> to vector<8xf32>
    %504 = vector.shape_cast %503 : vector<8xf32> to vector<1x8xf32>
    %505 = math.log %504 : vector<1x8xf32>
    %506 = arith.addf %499, %505 : vector<1x8xf32>
    %507 = vector.broadcast %90 : f32 to vector<1x8xf32>
    %508 = arith.subf %507, %506 : vector<1x8xf32>
    %c16_i32 = arith.constant 16 : i32
    %509 = vector.broadcast %508 : vector<1x8xf32> to vector<8x8xf32>
    %510 = arith.subf %509, %86 : vector<8x8xf32>
    %cst_104 = arith.constant dense<0xFF800000> : vector<8xf32>
    %511 = vector.multi_reduction <maximumf>, %510, %cst_104 [1] : vector<8x8xf32> to vector<8xf32>
    %512 = vector.shape_cast %511 : vector<8xf32> to vector<8x1xf32>
    %513 = vector.broadcast %512 : vector<8x1xf32> to vector<8x8xf32>
    %514 = arith.subf %510, %513 : vector<8x8xf32>
    %515 = math.exp %514 : vector<8x8xf32>
    %cst_105 = arith.constant dense<0.000000e+00> : vector<8xf32>
    %516 = vector.multi_reduction <add>, %515, %cst_105 [1] : vector<8x8xf32> to vector<8xf32>
    %517 = vector.shape_cast %516 : vector<8xf32> to vector<8x1xf32>
    %518 = math.log %517 : vector<8x1xf32>
    %519 = arith.addf %512, %518 : vector<8x1xf32>
    %520 = vector.broadcast %88 : f32 to vector<8x1xf32>
    %521 = arith.subf %520, %519 : vector<8x1xf32>
    %522 = vector.broadcast %521 : vector<8x1xf32> to vector<8x8xf32>
    %523 = arith.subf %522, %86 : vector<8x8xf32>
    %cst_106 = arith.constant dense<0xFF800000> : vector<8xf32>
    %524 = vector.multi_reduction <maximumf>, %523, %cst_106 [0] : vector<8x8xf32> to vector<8xf32>
    %525 = vector.shape_cast %524 : vector<8xf32> to vector<1x8xf32>
    %526 = vector.broadcast %525 : vector<1x8xf32> to vector<8x8xf32>
    %527 = arith.subf %523, %526 : vector<8x8xf32>
    %528 = math.exp %527 : vector<8x8xf32>
    %cst_107 = arith.constant dense<0.000000e+00> : vector<8xf32>
    %529 = vector.multi_reduction <add>, %528, %cst_107 [0] : vector<8x8xf32> to vector<8xf32>
    %530 = vector.shape_cast %529 : vector<8xf32> to vector<1x8xf32>
    %531 = math.log %530 : vector<1x8xf32>
    %532 = arith.addf %525, %531 : vector<1x8xf32>
    %533 = vector.broadcast %90 : f32 to vector<1x8xf32>
    %534 = arith.subf %533, %532 : vector<1x8xf32>
    %c17_i32 = arith.constant 17 : i32
    %535 = vector.broadcast %534 : vector<1x8xf32> to vector<8x8xf32>
    %536 = arith.subf %535, %86 : vector<8x8xf32>
    %cst_108 = arith.constant dense<0xFF800000> : vector<8xf32>
    %537 = vector.multi_reduction <maximumf>, %536, %cst_108 [1] : vector<8x8xf32> to vector<8xf32>
    %538 = vector.shape_cast %537 : vector<8xf32> to vector<8x1xf32>
    %539 = vector.broadcast %538 : vector<8x1xf32> to vector<8x8xf32>
    %540 = arith.subf %536, %539 : vector<8x8xf32>
    %541 = math.exp %540 : vector<8x8xf32>
    %cst_109 = arith.constant dense<0.000000e+00> : vector<8xf32>
    %542 = vector.multi_reduction <add>, %541, %cst_109 [1] : vector<8x8xf32> to vector<8xf32>
    %543 = vector.shape_cast %542 : vector<8xf32> to vector<8x1xf32>
    %544 = math.log %543 : vector<8x1xf32>
    %545 = arith.addf %538, %544 : vector<8x1xf32>
    %546 = vector.broadcast %88 : f32 to vector<8x1xf32>
    %547 = arith.subf %546, %545 : vector<8x1xf32>
    %548 = vector.broadcast %547 : vector<8x1xf32> to vector<8x8xf32>
    %549 = arith.subf %548, %86 : vector<8x8xf32>
    %cst_110 = arith.constant dense<0xFF800000> : vector<8xf32>
    %550 = vector.multi_reduction <maximumf>, %549, %cst_110 [0] : vector<8x8xf32> to vector<8xf32>
    %551 = vector.shape_cast %550 : vector<8xf32> to vector<1x8xf32>
    %552 = vector.broadcast %551 : vector<1x8xf32> to vector<8x8xf32>
    %553 = arith.subf %549, %552 : vector<8x8xf32>
    %554 = math.exp %553 : vector<8x8xf32>
    %cst_111 = arith.constant dense<0.000000e+00> : vector<8xf32>
    %555 = vector.multi_reduction <add>, %554, %cst_111 [0] : vector<8x8xf32> to vector<8xf32>
    %556 = vector.shape_cast %555 : vector<8xf32> to vector<1x8xf32>
    %557 = math.log %556 : vector<1x8xf32>
    %558 = arith.addf %551, %557 : vector<1x8xf32>
    %559 = vector.broadcast %90 : f32 to vector<1x8xf32>
    %560 = arith.subf %559, %558 : vector<1x8xf32>
    %c18_i32 = arith.constant 18 : i32
    %561 = vector.broadcast %560 : vector<1x8xf32> to vector<8x8xf32>
    %562 = arith.subf %561, %86 : vector<8x8xf32>
    %cst_112 = arith.constant dense<0xFF800000> : vector<8xf32>
    %563 = vector.multi_reduction <maximumf>, %562, %cst_112 [1] : vector<8x8xf32> to vector<8xf32>
    %564 = vector.shape_cast %563 : vector<8xf32> to vector<8x1xf32>
    %565 = vector.broadcast %564 : vector<8x1xf32> to vector<8x8xf32>
    %566 = arith.subf %562, %565 : vector<8x8xf32>
    %567 = math.exp %566 : vector<8x8xf32>
    %cst_113 = arith.constant dense<0.000000e+00> : vector<8xf32>
    %568 = vector.multi_reduction <add>, %567, %cst_113 [1] : vector<8x8xf32> to vector<8xf32>
    %569 = vector.shape_cast %568 : vector<8xf32> to vector<8x1xf32>
    %570 = math.log %569 : vector<8x1xf32>
    %571 = arith.addf %564, %570 : vector<8x1xf32>
    %572 = vector.broadcast %88 : f32 to vector<8x1xf32>
    %573 = arith.subf %572, %571 : vector<8x1xf32>
    %574 = vector.broadcast %573 : vector<8x1xf32> to vector<8x8xf32>
    %575 = arith.subf %574, %86 : vector<8x8xf32>
    %cst_114 = arith.constant dense<0xFF800000> : vector<8xf32>
    %576 = vector.multi_reduction <maximumf>, %575, %cst_114 [0] : vector<8x8xf32> to vector<8xf32>
    %577 = vector.shape_cast %576 : vector<8xf32> to vector<1x8xf32>
    %578 = vector.broadcast %577 : vector<1x8xf32> to vector<8x8xf32>
    %579 = arith.subf %575, %578 : vector<8x8xf32>
    %580 = math.exp %579 : vector<8x8xf32>
    %cst_115 = arith.constant dense<0.000000e+00> : vector<8xf32>
    %581 = vector.multi_reduction <add>, %580, %cst_115 [0] : vector<8x8xf32> to vector<8xf32>
    %582 = vector.shape_cast %581 : vector<8xf32> to vector<1x8xf32>
    %583 = math.log %582 : vector<1x8xf32>
    %584 = arith.addf %577, %583 : vector<1x8xf32>
    %585 = vector.broadcast %90 : f32 to vector<1x8xf32>
    %586 = arith.subf %585, %584 : vector<1x8xf32>
    %c19_i32 = arith.constant 19 : i32
    %587 = vector.broadcast %586 : vector<1x8xf32> to vector<8x8xf32>
    %588 = arith.subf %587, %86 : vector<8x8xf32>
    %cst_116 = arith.constant dense<0xFF800000> : vector<8xf32>
    %589 = vector.multi_reduction <maximumf>, %588, %cst_116 [1] : vector<8x8xf32> to vector<8xf32>
    %590 = vector.shape_cast %589 : vector<8xf32> to vector<8x1xf32>
    %591 = vector.broadcast %590 : vector<8x1xf32> to vector<8x8xf32>
    %592 = arith.subf %588, %591 : vector<8x8xf32>
    %593 = math.exp %592 : vector<8x8xf32>
    %cst_117 = arith.constant dense<0.000000e+00> : vector<8xf32>
    %594 = vector.multi_reduction <add>, %593, %cst_117 [1] : vector<8x8xf32> to vector<8xf32>
    %595 = vector.shape_cast %594 : vector<8xf32> to vector<8x1xf32>
    %596 = math.log %595 : vector<8x1xf32>
    %597 = arith.addf %590, %596 : vector<8x1xf32>
    %598 = vector.broadcast %88 : f32 to vector<8x1xf32>
    %599 = arith.subf %598, %597 : vector<8x1xf32>
    %600 = vector.broadcast %599 : vector<8x1xf32> to vector<8x8xf32>
    %601 = arith.subf %600, %86 : vector<8x8xf32>
    %cst_118 = arith.constant dense<0xFF800000> : vector<8xf32>
    %602 = vector.multi_reduction <maximumf>, %601, %cst_118 [0] : vector<8x8xf32> to vector<8xf32>
    %603 = vector.shape_cast %602 : vector<8xf32> to vector<1x8xf32>
    %604 = vector.broadcast %603 : vector<1x8xf32> to vector<8x8xf32>
    %605 = arith.subf %601, %604 : vector<8x8xf32>
    %606 = math.exp %605 : vector<8x8xf32>
    %cst_119 = arith.constant dense<0.000000e+00> : vector<8xf32>
    %607 = vector.multi_reduction <add>, %606, %cst_119 [0] : vector<8x8xf32> to vector<8xf32>
    %608 = vector.shape_cast %607 : vector<8xf32> to vector<1x8xf32>
    %609 = math.log %608 : vector<1x8xf32>
    %610 = arith.addf %603, %609 : vector<1x8xf32>
    %611 = vector.broadcast %90 : f32 to vector<1x8xf32>
    %612 = arith.subf %611, %610 : vector<1x8xf32>
    %613 = vector.broadcast %599 : vector<8x1xf32> to vector<8x8xf32>
    %614 = vector.broadcast %612 : vector<1x8xf32> to vector<8x8xf32>
    %615 = arith.addf %613, %614 : vector<8x8xf32>
    %616 = arith.subf %615, %86 : vector<8x8xf32>
    %617 = math.exp %616 : vector<8x8xf32>
    %618 = arith.mulf %617, %86 : vector<8x8xf32>
    %619 = vector.shape_cast %618 : vector<8x8xf32> to vector<1x8x8xf32>
    %cst_120 = arith.constant dense<0.000000e+00> : vector<1xf32>
    %620 = vector.multi_reduction <add>, %619, %cst_120 [1, 2] : vector<1x8x8xf32> to vector<1xf32>
    %621 = vector.shape_cast %620 : vector<1xf32> to vector<1x1x1xf32>
    %622 = vector.extract %621[0, 0, 0] : f32 from vector<1x1x1xf32>
    %cst_121 = arith.constant 1.000000e-01 : f32
    %623 = arith.mulf %cst_121, %622 : f32
    %624 = vector.broadcast %5 : vector<1x32xf32> to vector<8x32xf32>
    %625 = arith.subf %0, %624 : vector<8x32xf32>
    %626 = arith.mulf %625, %625 : vector<8x32xf32>
    %627 = vector.shape_cast %626 : vector<8x32xf32> to vector<1x8x32xf32>
    %cst_122 = arith.constant dense<0.000000e+00> : vector<1xf32>
    %628 = vector.multi_reduction <add>, %627, %cst_122 [1, 2] : vector<1x8x32xf32> to vector<1xf32>
    %629 = vector.shape_cast %628 : vector<1xf32> to vector<1x1x1xf32>
    %630 = vector.extract %629[0, 0, 0] : f32 from vector<1x1x1xf32>
    %cst_123 = arith.constant 1.000000e+00 : f32
    %cst_124 = arith.constant 8.000000e+00 : f32
    %631 = arith.divf %cst_123, %cst_124 : f32
    %632 = arith.mulf %630, %631 : f32
    %633 = tpu.iota {dimensions = array<i32: 1>} : vector<1x128xi32>
    %c0_i32_125 = arith.constant 0 : i32
    %634 = vector.broadcast %c0_i32_125 : i32 to vector<1x128xi32>
    %635 = arith.cmpi eq, %633, %634 : vector<1x128xi32>
    %cst_126 = arith.constant 0.000000e+00 : f32
    %636 = vector.broadcast %70 : f32 to vector<1x128xf32>
    %637 = vector.broadcast %cst_126 : f32 to vector<1x128xf32>
    %638 = arith.select %635, %636, %637 : vector<1x128xi1>, vector<1x128xf32>
    %c1_i32_127 = arith.constant 1 : i32
    %639 = vector.broadcast %c1_i32_127 : i32 to vector<1x128xi32>
    %640 = arith.cmpi eq, %633, %639 : vector<1x128xi32>
    %cst_128 = arith.constant 0.000000e+00 : f32
    %641 = vector.broadcast %623 : f32 to vector<1x128xf32>
    %642 = vector.broadcast %cst_128 : f32 to vector<1x128xf32>
    %643 = arith.select %640, %641, %642 : vector<1x128xi1>, vector<1x128xf32>
    %644 = arith.addf %638, %643 : vector<1x128xf32>
    %c2_i32_129 = arith.constant 2 : i32
    %645 = vector.broadcast %c2_i32_129 : i32 to vector<1x128xi32>
    %646 = arith.cmpi eq, %633, %645 : vector<1x128xi32>
    %cst_130 = arith.constant 0.000000e+00 : f32
    %647 = vector.broadcast %632 : f32 to vector<1x128xf32>
    %648 = vector.broadcast %cst_130 : f32 to vector<1x128xf32>
    %649 = arith.select %646, %647, %648 : vector<1x128xi1>, vector<1x128xf32>
    %650 = arith.addf %644, %649 : vector<1x128xf32>
    %c0_131 = arith.constant 0 : index
    %c0_132 = arith.constant 0 : index
    %651 = vector.load %arg7[%c0_131, %c0_132] : memref<1x128xf32, #tpu.memory_space<vmem>>, vector<1x128xf32>
    tpu.vector_store %arg7[%c0_131, %c0_132], %650 {strides = array<i32>} : memref<1x128xf32, #tpu.memory_space<vmem>>, vector<1x128xf32>,
    return
  }
  func.func @transform_0(%arg0: i32) -> (i32, i32) {
    %c0_i32 = arith.constant 0 : i32
    %c0_i32_0 = arith.constant 0 : i32
    %c0_i32_1 = arith.constant 0 : i32
    return %c0_i32, %c0_i32_0 : i32, i32
  }
  func.func @transform_1(%arg0: i32) -> (i32, i32) {
    %c0_i32 = arith.constant 0 : i32
    %c0_i32_0 = arith.constant 0 : i32
    %c0_i32_1 = arith.constant 0 : i32
    return %c0_i32, %c0_i32_0 : i32, i32
  }
  func.func @transform_2(%arg0: i32) -> (i32, i32) {
    %c0_i32 = arith.constant 0 : i32
    %c0_i32_0 = arith.constant 0 : i32
    %c0_i32_1 = arith.constant 0 : i32
    return %c0_i32, %c0_i32_0 : i32, i32
  }
  func.func @transform_3(%arg0: i32) -> (i32, i32) {
    %c0_i32 = arith.constant 0 : i32
    %c0_i32_0 = arith.constant 0 : i32
    %c0_i32_1 = arith.constant 0 : i32
    return %c0_i32, %c0_i32_0 : i32, i32
  }
  func.func @transform_4(%arg0: i32) -> (i32, i32) {
    %c0_i32 = arith.constant 0 : i32
    %c0_i32_0 = arith.constant 0 : i32
    %c0_i32_1 = arith.constant 0 : i32
    return %c0_i32, %c0_i32_0 : i32, i32
  }
  func.func @transform_5(%arg0: i32) -> (i32, i32) {
    %c0_i32 = arith.constant 0 : i32
    %c0_i32_0 = arith.constant 0 : i32
    %c0_i32_1 = arith.constant 0 : i32
    return %c0_i32, %c0_i32_0 : i32, i32
  }
  func.func @transform_6(%arg0: i32) -> (i32, i32) {
    %c0_i32 = arith.constant 0 : i32
    %c0_i32_0 = arith.constant 0 : i32
    %c0_i32_1 = arith.constant 0 : i32
    return %c0_i32, %c0_i32_0 : i32, i32
  }
}

</mosaic_0001>

<bundles_post_ra>
// kernel: reflection_head_forward.3
= control target key start
LH: loop header
LB: loop body
LE: loop exit
PB: predicated region body
PF: predicated region fallthrough
CT: control target
= control target key end

     0   :  { %vm56_vm0 = vcmask 261120   ;;  %s216_s1 = inlined_call_operand.vmem [shape: bf16[32,32], index: 1, kind: input, shape index: {}]   ;;  %s217_s2 = inlined_call_operand.vmem [shape: f32[1,32], index: 2, kind: input, shape index: {}]   ;;  %s218_s0 = inlined_call_operand.vmem [shape: bf16[48,32], index: 0, kind: input, shape index: {}]   ;;  %s219_s3 = inlined_call_operand.vmem [shape: f32[48,32], index: 3, kind: output, shape index: {}]  }
   0x1   :  { %v133_v0 = vld [vmem:[%s216_s1 + $0x8] sm:$0xff]  ;;  %v132_v1 = vld [vmem:[%s216_s1] sm:$0xff]  ;;  %v131_v4 = vld [vmem:[%s218_s0 + $0x10] sm:$0xff] }
   0x2   :  { %72 = vmatpush.bf16.msra.mxu0 %v133_v0  ;;  %134 = vmatpush.bf16.msra.mxu1 %v133_v0  ;;  %v129_v2 = vld [vmem:[%s218_s0] sm:$0xff]  ;;  %v130_v3 = vld [vmem:[%s218_s0 + $0x8] sm:$0xff] }
   0x3   :  { %135 = vmatpush.bf16.msra.mxu2 %v133_v0  ;;  %v138_v5 = vld [vmem:[%s217_s2] ss:$0 sm:$0xff] }
   0x6   :  { %73 = vmatpush.bf16.msra.mxu0 %v132_v1  ;;  %136 = vmatpush.bf16.msra.mxu1 %v132_v1 }
   0x7   :  { %137 = vmatpush.bf16.msra.mxu2 %v132_v1 }
   0x9   :  { %126 = vmatmul.msk.bf16.vlgmr.msra.gmra.mxu0 %vm56_vm0, %v129_v2  ;;  %127 = vmatmul.msk.bf16.vlgmr.msra.gmra.mxu1 %vm56_vm0, %v130_v3 }
   0xa   :  { %128 = vmatmul.msk.bf16.vlgmr.msra.gmra.mxu2 %vm56_vm0, %v131_v4 }
  0x86   :  { %v75_v6 = vpop.f32.mrf.mxu0  ;;  %v80_v7 = vpop.f32.mrf.mxu1 }
  0x87   :  { %v76_v8 = vadd.f32 %v138_v5, %v75_v6  ;;  %v81_v9 = vadd.f32 %v138_v5, %v80_v7 }
  0x89   :  { %139 = vtanh.f32 %v76_v8 }
  0x8a   :  { %141 = vtanh.f32 %v81_v9 }
  0x8d   :  { %v85_v10 = vpop.f32.mrf.mxu2 }
  0x8e   :  { %v86_v11 = vadd.f32 %v138_v5, %v85_v10  ;;  %v77_v12 = vpop.f32.mrf.mxu0  ;;  %v82_v13 = vpop.f32.mrf.mxu1 }
  0x8f   :  { %v140_v14 = vpop.eup %139  ;;  %v78_v15 = vadd.f32 %v138_v5, %v77_v12  ;;  %v83_v16 = vadd.f32 %v138_v5, %v82_v13 }
  0x90   :  { %v142_v17 = vpop.eup %141  ;;  %96 = vst.msk [vmem:[%s219_s3] sm:$0xff] %vm56_vm0, %v140_v14  ;;  %143 = vtanh.f32 %v86_v11 }
  0x91   :  { %98 = vst.msk [vmem:[%s219_s3 + $0x10] sm:$0xff] %vm56_vm0, %v142_v17  ;;  %145 = vtanh.f32 %v78_v15 }
  0x92   :  { %147 = vtanh.f32 %v83_v16 }
  0x95   :  { %v87_v18 = vpop.f32.mrf.mxu2 }
  0x96   :  { %v144_v19 = vpop.eup %143  ;;  %v88_v20 = vadd.f32 %v138_v5, %v87_v18 }
  0x97   :  { %v146_v21 = vpop.eup %145  ;;  %100 = vst.msk [vmem:[%s219_s3 + $0x20] sm:$0xff] %vm56_vm0, %v144_v19 }
  0x98   :  { %v148_v22 = vpop.eup %147  ;;  %97 = vst.msk [vmem:[%s219_s3 + $0x8] sm:$0xff] %vm56_vm0, %v146_v21  ;;  %149 = vtanh.f32 %v88_v20 }
  0x99   :  { %99 = vst.msk [vmem:[%s219_s3 + $0x18] sm:$0xff] %vm56_vm0, %v148_v22 }
  0x9e   :  { %v150_v23 = vpop.eup %149 }
  0x9f   :  { %101 = vst.msk [vmem:[%s219_s3 + $0x28] sm:$0xff] %vm56_vm0, %v150_v23 }

// kernel: reflection_head_forward.4
= control target key start
LH: loop header
LB: loop body
LE: loop exit
PB: predicated region body
PF: predicated region fallthrough
CT: control target
= control target key end

     0   :  { %vm34_vm0 = vcmask 130048   ;;  %vm52_vm1 = vcmask 261120   ;;  %s106_s1 = inlined_call_operand.vmem [shape: bf16[16,32], index: 1, kind: input, shape index: {}]   ;;  %s107_s0 = inlined_call_operand.vmem [shape: bf16[16,16], index: 0, kind: input, shape index: {}]   ;;  %s108_s2 = inlined_call_operand.vmem [shape: f32[1,32], index: 2, kind: input, shape index: {}]   ;;  %s109_s3 = inlined_call_operand.vmem [shape: f32[16,32], index: 3, kind: output, shape index: {}]  }
   0x1   :  { %v69_v0 = vld [vmem:[%s106_s1] sm:$0xff] }
   0x2   :  { %v68_v1 = vld [vmem:[%s107_s0] sm:$0xff]  ;;  %45 = vmatpush.bf16.msra.mxu0 %v69_v0 }
   0x3   :  { %v70_v2 = vld [vmem:[%s108_s2] ss:$0 sm:$0xff] }
   0x5   :  { %67 = vmatmul.msk.bf16.vlgmr.msra.gmra.mxu0 %vm34_vm0, %v68_v1 }
  0x82   :  { %v47_v3 = vpop.f32.mrf.mxu0 }
  0x83   :  { %v48_v4 = vadd.f32 %v70_v2, %v47_v3 }
  0x85   :  { %53 = vst.msk [vmem:[%s109_s3] sm:$0xff] %vm52_vm1, %v48_v4 }
  0x8a   :  { %v49_v5 = vpop.f32.mrf.mxu0 }
  0x8b   :  { %v50_v6 = vadd.f32 %v70_v2, %v49_v5 }
  0x8d   :  { %54 = vst.msk [vmem:[%s109_s3 + $0x8] sm:$0xff] %vm52_vm1, %v50_v6 }

// kernel: reflection_head_forward.5
= control target key start
LH: loop header
LB: loop body
LE: loop exit
PB: predicated region body
PF: predicated region fallthrough
CT: control target
= control target key end

     0   :  { %vm29_vm0 = vcmask 261120   ;;  %vm239_vm1 = vcmask 64512   ;;  %vm62_vm2 = vcmask 254976   ;;  %vm79_vm4 = vcmask 256000   ;;  %s1414_s0 = inlined_call_operand.vmem [shape: f32[8,32], index: 0, kind: input, shape index: {}]   ;;  %s1415_s4 = inlined_call_operand.vmem [shape: f32[8,32], index: 4, kind: input, shape index: {}]   ;;  %s1416_s1 = inlined_call_operand.vmem [shape: f32[2,32], index: 1, kind: input, shape index: {}]   ;;  %s1417_s2 = inlined_call_operand.vmem [shape: f32[3,32], index: 2, kind: input, shape index: {}]   ;;  %s1418_s3 = inlined_call_operand.vmem [shape: f32[3,1], index: 3, kind: input, shape index: {}]   ;;  %s1419_s5 = inlined_call_operand.vmem [shape: f32[1,32], index: 5, kind: input, shape index: {}]   ;;  %s1420_s6 = inlined_call_operand.vmem [shape: f32[1,128], index: 6, kind: output, shape index: {}]  }
   0x1   :  { %v23_v0 = vld [vmem:[%s1414_s0] sm:$0xff]  ;;  %vm105_vm14 = vcmask 1041408   ;;  %vm114_vm15 = vcmask 1042432  }
   0x2   :  { %v171_v1 = vmul.f32 %v23_v0, %v23_v0  ;;  %1009 = vmatpush.xpose.msk.msra.mxu0 %vm29_vm0, %v23_v0  ;;  %v27_v3 = vld [vmem:[%s1415_s4] sm:$0xff] }
   0x3   :  { %v167_v4 = vmul.f32 %v27_v3, %v27_v3 }
   0x4   :  { %v172_v2 = vsel %vm29_vm0, %v171_v1, 0.0 }
   0x5   :  { %173 = vadd.xlane.f32.xlu0 %v172_v2  ;;  %1010 = vmatmul.msk.f32.vlgmr.msra.gmra.mxu0 %vm29_vm0, %v27_v3  ;;  %v168_v5 = vsel %vm29_vm0, %v167_v4, 0.0 }
   0xd   :  { %169 = vadd.xlane.f32.xlu0 %v168_v5 }
  0x78   :  { %v174_v6 = vpop.xlane.xlu0 %173 }
  0x79   :  { %201 = vxpose.xlu1.b32.start.end [1/1] (short) (narrow) %v174_v6, 8 }
  0x80   :  { %v170_v9 = vpop.xlane.xlu0 %169 }
  0x82   :  { %v198_v7 = vpop.f32.mrf.mxu0 }
  0x83   :  { %v235_v11 = vmul.f32 2.0, %v198_v7 }
 0x11d   :  { %v217_v8 = vpop.trf.xlu1 }
 0x11e   :  { %v233_v10 = vperm.slane %v217_v8, 0 }
 0x120   :  { %v234_v12 = vadd.f32 %v233_v10, %v170_v9 }
 0x122   :  { %v236_v13 = vsub.f32 %v234_v12, %v235_v11 }
 0x124   :  { %v1255_v14 = vmul.f32 10.0, %v236_v13 }
 0x126   :  { %v238_v15 = vsub.f32 0.0, %v1255_v14 }
 0x128   :  { %v240_v16 = vsel %vm239_vm1, %v238_v15, -inf }
 0x129   :  { %241 = vmax.xlane.f32.xlu1 %v240_v16 }
 0x19c   :  { %v242_v17 = vpop.xlane.xlu1 %241 }
 0x19d   :  { %v243_v18 = vsub.f32 %v238_v15, %v242_v17 }
 0x19f   :  { %v244_v19 = vmul.f32 1.442695, %v243_v18 }
 0x1a1   :  { %1030 = vpow2.f32 %v244_v19 }
 0x1a7   :  { %v1031_v20 = vpop.eup %1030 }
 0x1a8   :  { %v246_v21 = vsel %vm239_vm1, %v1031_v20, 0.0 }
 0x1a9   :  { %247 = vadd.xlane.f32.xlu2 %v246_v21 }
 0x21c   :  { %v248_v22 = vpop.xlane.xlu2 %247 }
 0x21d   :  { %1032 = vlog2.f32 %v248_v22 }
 0x223   :  { %v1033_v23 = vpop.eup %1032 }
 0x224   :  { %v250_v24 = vmul.f32 0.6931472, %v1033_v23 }
 0x226   :  { %v251_v25 = vadd.f32 %v250_v24, %v242_v17 }
 0x228   :  { %v252_v26 = vsub.f32 -2.0794415, %v251_v25 }
 0x22a   :  { %v253_v27 = vsub.f32 %v252_v26, %v1255_v14 }
 0x22c   :  { %v254_v28 = vsel %vm239_vm1, %v253_v27, -inf }
 0x22d   :  { %v255_v29 = vrot.slane %v254_v28, 4 }
 0x22f   :  { %v256_v30 = vmax.f32 %v254_v28, %v255_v29 }
 0x231   :  { %v257_v31 = vrot.slane %v256_v30, 2 }
 0x233   :  { %v258_v32 = vmax.f32 %v256_v30, %v257_v31 }
 0x235   :  { %v259_v33 = vrot.slane %v258_v32, 1 }
 0x237   :  { %v260_v34 = vmax.f32 %v258_v32, %v259_v33 }
 0x239   :  { %v261_v35 = vsub.f32 %v253_v27, %v260_v34 }
 0x23b   :  { %v262_v36 = vmul.f32 1.442695, %v261_v35 }
 0x23d   :  { %1034 = vpow2.f32 %v262_v36 }
 0x243   :  { %v1035_v37 = vpop.eup %1034 }
 0x244   :  { %v264_v38 = vsel %vm239_vm1, %v1035_v37, 0.0 }
 0x245   :  { %v265_v39 = vrot.slane %v264_v38, 4 }
 0x247   :  { %v266_v40 = vadd.f32 %v265_v39, %v264_v38 }
 0x249   :  { %v267_v41 = vrot.slane %v266_v40, 2 }
 0x24b   :  { %v268_v42 = vadd.f32 %v267_v41, %v266_v40 }
 0x24d   :  { %v269_v43 = vrot.slane %v268_v42, 1 }
 0x24f   :  { %v270_v44 = vadd.f32 %v269_v43, %v268_v42 }
 0x251   :  { %1036 = vlog2.f32 %v270_v44 }
 0x257   :  { %v1037_v45 = vpop.eup %1036 }
 0x258   :  { %v272_v46 = vmul.f32 0.6931472, %v1037_v45 }
 0x25a   :  { %v273_v47 = vadd.f32 %v272_v46, %v260_v34 }
 0x25c   :  { %v274_v48 = vsub.f32 -2.0794415, %v273_v47 }
 0x25e   :  { %v275_v49 = vsub.f32 %v274_v48, %v1255_v14 }
 0x260   :  { %v276_v50 = vsel %vm239_vm1, %v275_v49, -inf }
 0x261   :  { %277 = vmax.xlane.f32.xlu2 %v276_v50 }
 0x2d4   :  { %v278_v51 = vpop.xlane.xlu2 %277 }
 0x2d5   :  { %v279_v52 = vsub.f32 %v275_v49, %v278_v51 }
 0x2d7   :  { %v280_v53 = vmul.f32 1.442695, %v279_v52 }
 0x2d9   :  { %1038 = vpow2.f32 %v280_v53 }
 0x2df   :  { %v1039_v54 = vpop.eup %1038 }
 0x2e0   :  { %v282_v55 = vsel %vm239_vm1, %v1039_v54, 0.0 }
 0x2e1   :  { %283 = vadd.xlane.f32.xlu0 %v282_v55 }
 0x354   :  { %v284_v56 = vpop.xlane.xlu0 %283 }
 0x355   :  { %1040 = vlog2.f32 %v284_v56 }
 0x35b   :  { %v1041_v57 = vpop.eup %1040 }
 0x35c   :  { %v286_v58 = vmul.f32 0.6931472, %v1041_v57 }
 0x35e   :  { %v287_v59 = vadd.f32 %v286_v58, %v278_v51 }
 0x360   :  { %v288_v60 = vsub.f32 -2.0794415, %v287_v59 }
 0x362   :  { %v289_v61 = vsub.f32 %v288_v60, %v1255_v14 }
 0x364   :  { %v290_v62 = vsel %vm239_vm1, %v289_v61, -inf }
 0x365   :  { %v291_v63 = vrot.slane %v290_v62, 4 }
 0x367   :  { %v292_v0 = vmax.f32 %v290_v62, %v291_v63 }
 0x369   :  { %v293_v1 = vrot.slane %v292_v0, 2 }
 0x36b   :  { %v294_v2 = vmax.f32 %v292_v0, %v293_v1 }
 0x36d   :  { %v295_v3 = vrot.slane %v294_v2, 1 }
 0x36f   :  { %v296_v4 = vmax.f32 %v294_v2, %v295_v3 }
 0x371   :  { %v297_v5 = vsub.f32 %v289_v61, %v296_v4 }
 0x373   :  { %v298_v6 = vmul.f32 1.442695, %v297_v5 }
 0x375   :  { %1042 = vpow2.f32 %v298_v6 }
 0x37b   :  { %v1043_v7 = vpop.eup %1042 }
 0x37c   :  { %v300_v8 = vsel %vm239_vm1, %v1043_v7, 0.0 }
 0x37d   :  { %v301_v9 = vrot.slane %v300_v8, 4 }
 0x37f   :  { %v302_v10 = vadd.f32 %v301_v9, %v300_v8 }
 0x381   :  { %v303_v11 = vrot.slane %v302_v10, 2 }
 0x383   :  { %v304_v12 = vadd.f32 %v303_v11, %v302_v10 }
 0x385   :  { %v305_v13 = vrot.slane %v304_v12, 1 }
 0x387   :  { %v306_v15 = vadd.f32 %v305_v13, %v304_v12 }
 0x389   :  { %1044 = vlog2.f32 %v306_v15 }
 0x38f   :  { %v1045_v16 = vpop.eup %1044 }
 0x390   :  { %v308_v17 = vmul.f32 0.6931472, %v1045_v16 }
 0x392   :  { %v309_v18 = vadd.f32 %v308_v17, %v296_v4 }
 0x394   :  { %v310_v19 = vsub.f32 -2.0794415, %v309_v18 }
 0x396   :  { %v311_v20 = vsub.f32 %v310_v19, %v1255_v14 }
 0x398   :  { %v312_v21 = vsel %vm239_vm1, %v311_v20, -inf }
 0x399   :  { %313 = vmax.xlane.f32.xlu2 %v312_v21 }
 0x40c   :  { %v314_v22 = vpop.xlane.xlu2 %313 }
 0x40d   :  { %v315_v23 = vsub.f32 %v311_v20, %v314_v22 }
 0x40f   :  { %v316_v24 = vmul.f32 1.442695, %v315_v23 }
 0x411   :  { %1046 = vpow2.f32 %v316_v24 }
 0x417   :  { %v1047_v25 = vpop.eup %1046 }
 0x418   :  { %v318_v26 = vsel %vm239_vm1, %v1047_v25, 0.0 }
 0x419   :  { %319 = vadd.xlane.f32.xlu0 %v318_v26 }
 0x48c   :  { %v320_v27 = vpop.xlane.xlu0 %319 }
 0x48d   :  { %1048 = vlog2.f32 %v320_v27 }
 0x493   :  { %v1049_v28 = vpop.eup %1048 }
 0x494   :  { %v322_v29 = vmul.f32 0.6931472, %v1049_v28 }
 0x496   :  { %v323_v30 = vadd.f32 %v322_v29, %v314_v22 }
 0x498   :  { %v324_v31 = vsub.f32 -2.0794415, %v323_v30 }
 0x49a   :  { %v325_v32 = vsub.f32 %v324_v31, %v1255_v14 }
 0x49c   :  { %v326_v33 = vsel %vm239_vm1, %v325_v32, -inf }
 0x49d   :  { %v327_v34 = vrot.slane %v326_v33, 4 }
 0x49f   :  { %v328_v35 = vmax.f32 %v326_v33, %v327_v34 }
 0x4a1   :  { %v329_v36 = vrot.slane %v328_v35, 2 }
 0x4a3   :  { %v330_v37 = vmax.f32 %v328_v35, %v329_v36 }
 0x4a5   :  { %v331_v38 = vrot.slane %v330_v37, 1 }
 0x4a7   :  { %v332_v39 = vmax.f32 %v330_v37, %v331_v38 }
 0x4a9   :  { %v333_v40 = vsub.f32 %v325_v32, %v332_v39 }
 0x4ab   :  { %v334_v41 = vmul.f32 1.442695, %v333_v40 }
 0x4ad   :  { %1050 = vpow2.f32 %v334_v41 }
 0x4b3   :  { %v1051_v42 = vpop.eup %1050 }
 0x4b4   :  { %v336_v43 = vsel %vm239_vm1, %v1051_v42, 0.0 }
 0x4b5   :  { %v337_v44 = vrot.slane %v336_v43, 4 }
 0x4b7   :  { %v338_v45 = vadd.f32 %v337_v44, %v336_v43 }
 0x4b9   :  { %v339_v46 = vrot.slane %v338_v45, 2 }
 0x4bb   :  { %v340_v47 = vadd.f32 %v339_v46, %v338_v45 }
 0x4bd   :  { %v341_v48 = vrot.slane %v340_v47, 1 }
 0x4bf   :  { %v342_v49 = vadd.f32 %v341_v48, %v340_v47 }
 0x4c1   :  { %1052 = vlog2.f32 %v342_v49 }
 0x4c7   :  { %v1053_v50 = vpop.eup %1052 }
 0x4c8   :  { %v344_v51 = vmul.f32 0.6931472, %v1053_v50 }
 0x4ca   :  { %v345_v52 = vadd.f32 %v344_v51, %v332_v39 }
 0x4cc   :  { %v346_v53 = vsub.f32 -2.0794415, %v345_v52 }
 0x4ce   :  { %v347_v54 = vsub.f32 %v346_v53, %v1255_v14 }
 0x4d0   :  { %v348_v55 = vsel %vm239_vm1, %v347_v54, -inf }
 0x4d1   :  { %349 = vmax.xlane.f32.xlu2 %v348_v55 }
 0x544   :  { %v350_v56 = vpop.xlane.xlu2 %349 }
 0x545   :  { %v351_v57 = vsub.f32 %v347_v54, %v350_v56 }
 0x547   :  { %v352_v58 = vmul.f32 1.442695, %v351_v57 }
 0x549   :  { %1054 = vpow2.f32 %v352_v58 }
 0x54f   :  { %v1055_v59 = vpop.eup %1054 }
 0x550   :  { %v354_v60 = vsel %vm239_vm1, %v1055_v59, 0.0 }
 0x551   :  { %355 = vadd.xlane.f32.xlu0 %v354_v60 }
 0x5c4   :  { %v356_v61 = vpop.xlane.xlu0 %355 }
 0x5c5   :  { %1056 = vlog2.f32 %v356_v61 }
 0x5cb   :  { %v1057_v62 = vpop.eup %1056 }
 0x5cc   :  { %v358_v63 = vmul.f32 0.6931472, %v1057_v62 }
 0x5ce   :  { %v359_v0 = vadd.f32 %v358_v63, %v350_v56 }
 0x5d0   :  { %v360_v1 = vsub.f32 -2.0794415, %v359_v0 }
 0x5d2   :  { %v361_v2 = vsub.f32 %v360_v1, %v1255_v14 }
 0x5d4   :  { %v362_v3 = vsel %vm239_vm1, %v361_v2, -inf }
 0x5d5   :  { %v363_v4 = vrot.slane %v362_v3, 4 }
 0x5d7   :  { %v364_v5 = vmax.f32 %v362_v3, %v363_v4 }
 0x5d9   :  { %v365_v6 = vrot.slane %v364_v5, 2 }
 0x5db   :  { %v366_v7 = vmax.f32 %v364_v5, %v365_v6 }
 0x5dd   :  { %v367_v8 = vrot.slane %v366_v7, 1 }
 0x5df   :  { %v368_v9 = vmax.f32 %v366_v7, %v367_v8 }
 0x5e1   :  { %v369_v10 = vsub.f32 %v361_v2, %v368_v9 }
 0x5e3   :  { %v370_v11 = vmul.f32 1.442695, %v369_v10 }
 0x5e5   :  { %1058 = vpow2.f32 %v370_v11 }
 0x5eb   :  { %v1059_v12 = vpop.eup %1058 }
 0x5ec   :  { %v372_v13 = vsel %vm239_vm1, %v1059_v12, 0.0 }
 0x5ed   :  { %v373_v15 = vrot.slane %v372_v13, 4 }
 0x5ef   :  { %v374_v16 = vadd.f32 %v373_v15, %v372_v13 }
 0x5f1   :  { %v375_v17 = vrot.slane %v374_v16, 2 }
 0x5f3   :  { %v376_v18 = vadd.f32 %v375_v17, %v374_v16 }
 0x5f5   :  { %v377_v19 = vrot.slane %v376_v18, 1 }
 0x5f7   :  { %v378_v20 = vadd.f32 %v377_v19, %v376_v18 }
 0x5f9   :  { %1060 = vlog2.f32 %v378_v20 }
 0x5ff   :  { %v1061_v21 = vpop.eup %1060 }
 0x600   :  { %v380_v22 = vmul.f32 0.6931472, %v1061_v21 }
 0x602   :  { %v381_v23 = vadd.f32 %v380_v22, %v368_v9 }
 0x604   :  { %v382_v24 = vsub.f32 -2.0794415, %v381_v23 }
 0x606   :  { %v383_v25 = vsub.f32 %v382_v24, %v1255_v14 }
 0x608   :  { %v384_v26 = vsel %vm239_vm1, %v383_v25, -inf }
 0x609   :  { %385 = vmax.xlane.f32.xlu2 %v384_v26 }
 0x67c   :  { %v386_v27 = vpop.xlane.xlu2 %385 }
 0x67d   :  { %v387_v28 = vsub.f32 %v383_v25, %v386_v27 }
 0x67f   :  { %v388_v29 = vmul.f32 1.442695, %v387_v28 }
 0x681   :  { %1062 = vpow2.f32 %v388_v29 }
 0x687   :  { %v1063_v30 = vpop.eup %1062 }
 0x688   :  { %v390_v31 = vsel %vm239_vm1, %v1063_v30, 0.0 }
 0x689   :  { %391 = vadd.xlane.f32.xlu0 %v390_v31 }
 0x6fc   :  { %v392_v32 = vpop.xlane.xlu0 %391 }
 0x6fd   :  { %1064 = vlog2.f32 %v392_v32 }
 0x703   :  { %v1065_v33 = vpop.eup %1064 }
 0x704   :  { %v394_v34 = vmul.f32 0.6931472, %v1065_v33 }
 0x706   :  { %v395_v35 = vadd.f32 %v394_v34, %v386_v27 }
 0x708   :  { %v396_v36 = vsub.f32 -2.0794415, %v395_v35 }
 0x70a   :  { %v397_v37 = vsub.f32 %v396_v36, %v1255_v14 }
 0x70c   :  { %v398_v38 = vsel %vm239_vm1, %v397_v37, -inf }
 0x70d   :  { %v399_v39 = vrot.slane %v398_v38, 4 }
 0x70f   :  { %v400_v40 = vmax.f32 %v398_v38, %v399_v39 }
 0x711   :  { %v401_v41 = vrot.slane %v400_v40, 2 }
 0x713   :  { %v402_v42 = vmax.f32 %v400_v40, %v401_v41 }
 0x715   :  { %v403_v43 = vrot.slane %v402_v42, 1 }
 0x717   :  { %v404_v44 = vmax.f32 %v402_v42, %v403_v43 }
 0x719   :  { %v405_v45 = vsub.f32 %v397_v37, %v404_v44 }
 0x71b   :  { %v406_v46 = vmul.f32 1.442695, %v405_v45 }
 0x71d   :  { %1066 = vpow2.f32 %v406_v46 }
 0x723   :  { %v1067_v47 = vpop.eup %1066 }
 0x724   :  { %v408_v48 = vsel %vm239_vm1, %v1067_v47, 0.0 }
 0x725   :  { %v409_v49 = vrot.slane %v408_v48, 4 }
 0x727   :  { %v410_v50 = vadd.f32 %v409_v49, %v408_v48 }
 0x729   :  { %v411_v51 = vrot.slane %v410_v50, 2 }
 0x72b   :  { %v412_v52 = vadd.f32 %v411_v51, %v410_v50 }
 0x72d   :  { %v413_v53 = vrot.slane %v412_v52, 1 }
 0x72f   :  { %v414_v54 = vadd.f32 %v413_v53, %v412_v52 }
 0x731   :  { %1068 = vlog2.f32 %v414_v54 }
 0x737   :  { %v1069_v55 = vpop.eup %1068 }
 0x738   :  { %v416_v56 = vmul.f32 0.6931472, %v1069_v55 }
 0x73a   :  { %v417_v57 = vadd.f32 %v416_v56, %v404_v44 }
 0x73c   :  { %v418_v58 = vsub.f32 -2.0794415, %v417_v57 }
 0x73e   :  { %v419_v59 = vsub.f32 %v418_v58, %v1255_v14 }
 0x740   :  { %v420_v60 = vsel %vm239_vm1, %v419_v59, -inf }
 0x741   :  { %421 = vmax.xlane.f32.xlu2 %v420_v60 }
 0x7b4   :  { %v422_v61 = vpop.xlane.xlu2 %421 }
 0x7b5   :  { %v423_v62 = vsub.f32 %v419_v59, %v422_v61 }
 0x7b7   :  { %v424_v63 = vmul.f32 1.442695, %v423_v62 }
 0x7b9   :  { %1070 = vpow2.f32 %v424_v63 }
 0x7bf   :  { %v1071_v0 = vpop.eup %1070 }
 0x7c0   :  { %v426_v1 = vsel %vm239_vm1, %v1071_v0, 0.0 }
 0x7c1   :  { %427 = vadd.xlane.f32.xlu0 %v426_v1 }
 0x834   :  { %v428_v2 = vpop.xlane.xlu0 %427 }
 0x835   :  { %1072 = vlog2.f32 %v428_v2 }
 0x83b   :  { %v1073_v3 = vpop.eup %1072 }
 0x83c   :  { %v430_v4 = vmul.f32 0.6931472, %v1073_v3 }
 0x83e   :  { %v431_v5 = vadd.f32 %v430_v4, %v422_v61 }
 0x840   :  { %v432_v6 = vsub.f32 -2.0794415, %v431_v5 }
 0x842   :  { %v433_v7 = vsub.f32 %v432_v6, %v1255_v14 }
 0x844   :  { %v434_v8 = vsel %vm239_vm1, %v433_v7, -inf }
 0x845   :  { %v435_v9 = vrot.slane %v434_v8, 4 }
 0x847   :  { %v436_v10 = vmax.f32 %v434_v8, %v435_v9 }
 0x849   :  { %v437_v11 = vrot.slane %v436_v10, 2 }
 0x84b   :  { %v438_v12 = vmax.f32 %v436_v10, %v437_v11 }
 0x84d   :  { %v439_v13 = vrot.slane %v438_v12, 1 }
 0x84f   :  { %v440_v15 = vmax.f32 %v438_v12, %v439_v13 }
 0x851   :  { %v441_v16 = vsub.f32 %v433_v7, %v440_v15 }
 0x853   :  { %v442_v17 = vmul.f32 1.442695, %v441_v16 }
 0x855   :  { %1074 = vpow2.f32 %v442_v17 }
 0x85b   :  { %v1075_v18 = vpop.eup %1074 }
 0x85c   :  { %v444_v19 = vsel %vm239_vm1, %v1075_v18, 0.0 }
 0x85d   :  { %v445_v20 = vrot.slane %v444_v19, 4 }
 0x85f   :  { %v446_v21 = vadd.f32 %v445_v20, %v444_v19 }
 0x861   :  { %v447_v22 = vrot.slane %v446_v21, 2 }
 0x863   :  { %v448_v23 = vadd.f32 %v447_v22, %v446_v21 }
 0x865   :  { %v449_v24 = vrot.slane %v448_v23, 1 }
 0x867   :  { %v450_v25 = vadd.f32 %v449_v24, %v448_v23 }
 0x869   :  { %1076 = vlog2.f32 %v450_v25 }
 0x86f   :  { %v1077_v26 = vpop.eup %1076 }
 0x870   :  { %v452_v27 = vmul.f32 0.6931472, %v1077_v26 }
 0x872   :  { %v453_v28 = vadd.f32 %v452_v27, %v440_v15 }
 0x874   :  { %v454_v29 = vsub.f32 -2.0794415, %v453_v28 }
 0x876   :  { %v455_v30 = vsub.f32 %v454_v29, %v1255_v14 }
 0x878   :  { %v456_v31 = vsel %vm239_vm1, %v455_v30, -inf }
 0x879   :  { %457 = vmax.xlane.f32.xlu2 %v456_v31 }
 0x8ec   :  { %v458_v32 = vpop.xlane.xlu2 %457 }
 0x8ed   :  { %v459_v33 = vsub.f32 %v455_v30, %v458_v32 }
 0x8ef   :  { %v460_v34 = vmul.f32 1.442695, %v459_v33 }
 0x8f1   :  { %1078 = vpow2.f32 %v460_v34 }
 0x8f7   :  { %v1079_v35 = vpop.eup %1078 }
 0x8f8   :  { %v462_v36 = vsel %vm239_vm1, %v1079_v35, 0.0 }
 0x8f9   :  { %463 = vadd.xlane.f32.xlu0 %v462_v36 }
 0x96c   :  { %v464_v37 = vpop.xlane.xlu0 %463 }
 0x96d   :  { %1080 = vlog2.f32 %v464_v37 }
 0x973   :  { %v1081_v38 = vpop.eup %1080 }
 0x974   :  { %v466_v39 = vmul.f32 0.6931472, %v1081_v38 }
 0x976   :  { %v467_v40 = vadd.f32 %v466_v39, %v458_v32 }
 0x978   :  { %v468_v41 = vsub.f32 -2.0794415, %v467_v40 }
 0x97a   :  { %v469_v42 = vsub.f32 %v468_v41, %v1255_v14 }
 0x97c   :  { %v470_v43 = vsel %vm239_vm1, %v469_v42, -inf }
 0x97d   :  { %v471_v44 = vrot.slane %v470_v43, 4 }
 0x97f   :  { %v472_v45 = vmax.f32 %v470_v43, %v471_v44 }
 0x981   :  { %v473_v46 = vrot.slane %v472_v45, 2 }
 0x983   :  { %v474_v47 = vmax.f32 %v472_v45, %v473_v46 }
 0x985   :  { %v475_v48 = vrot.slane %v474_v47, 1 }
 0x987   :  { %v476_v49 = vmax.f32 %v474_v47, %v475_v48 }
 0x989   :  { %v477_v50 = vsub.f32 %v469_v42, %v476_v49 }
 0x98b   :  { %v478_v51 = vmul.f32 1.442695, %v477_v50 }
 0x98d   :  { %1082 = vpow2.f32 %v478_v51 }
 0x993   :  { %v1083_v52 = vpop.eup %1082 }
 0x994   :  { %v480_v53 = vsel %vm239_vm1, %v1083_v52, 0.0 }
 0x995   :  { %v481_v54 = vrot.slane %v480_v53, 4 }
 0x997   :  { %v482_v55 = vadd.f32 %v481_v54, %v480_v53 }
 0x999   :  { %v483_v56 = vrot.slane %v482_v55, 2 }
 0x99b   :  { %v484_v57 = vadd.f32 %v483_v56, %v482_v55 }
 0x99d   :  { %v485_v58 = vrot.slane %v484_v57, 1 }
 0x99f   :  { %v486_v59 = vadd.f32 %v485_v58, %v484_v57 }
 0x9a1   :  { %1084 = vlog2.f32 %v486_v59 }
 0x9a7   :  { %v1085_v60 = vpop.eup %1084 }
 0x9a8   :  { %v488_v61 = vmul.f32 0.6931472, %v1085_v60 }
 0x9aa   :  { %v489_v62 = vadd.f32 %v488_v61, %v476_v49 }
 0x9ac   :  { %v490_v63 = vsub.f32 -2.0794415, %v489_v62 }
 0x9ae   :  { %v491_v0 = vsub.f32 %v490_v63, %v1255_v14 }
 0x9b0   :  { %v492_v1 = vsel %vm239_vm1, %v491_v0, -inf }
 0x9b1   :  { %493 = vmax.xlane.f32.xlu2 %v492_v1 }
 0xa24   :  { %v494_v2 = vpop.xlane.xlu2 %493 }
 0xa25   :  { %v495_v3 = vsub.f32 %v491_v0, %v494_v2 }
 0xa27   :  { %v496_v4 = vmul.f32 1.442695, %v495_v3 }
 0xa29   :  { %1086 = vpow2.f32 %v496_v4 }
 0xa2f   :  { %v1087_v5 = vpop.eup %1086 }
 0xa30   :  { %v498_v6 = vsel %vm239_vm1, %v1087_v5, 0.0 }
 0xa31   :  { %499 = vadd.xlane.f32.xlu0 %v498_v6 }
 0xaa4   :  { %v500_v7 = vpop.xlane.xlu0 %499 }
 0xaa5   :  { %1088 = vlog2.f32 %v500_v7 }
 0xaab   :  { %v1089_v8 = vpop.eup %1088 }
 0xaac   :  { %v502_v9 = vmul.f32 0.6931472, %v1089_v8 }
 0xaae   :  { %v503_v10 = vadd.f32 %v502_v9, %v494_v2 }
 0xab0   :  { %v504_v11 = vsub.f32 -2.0794415, %v503_v10 }
 0xab2   :  { %v505_v12 = vsub.f32 %v504_v11, %v1255_v14 }
 0xab4   :  { %v506_v13 = vsel %vm239_vm1, %v505_v12, -inf }
 0xab5   :  { %v507_v15 = vrot.slane %v506_v13, 4 }
 0xab7   :  { %v508_v16 = vmax.f32 %v506_v13, %v507_v15 }
 0xab9   :  { %v509_v17 = vrot.slane %v508_v16, 2 }
 0xabb   :  { %v510_v18 = vmax.f32 %v508_v16, %v509_v17 }
 0xabd   :  { %v511_v19 = vrot.slane %v510_v18, 1 }
 0xabf   :  { %v512_v20 = vmax.f32 %v510_v18, %v511_v19 }
 0xac1   :  { %v513_v21 = vsub.f32 %v505_v12, %v512_v20 }
 0xac3   :  { %v514_v22 = vmul.f32 1.442695, %v513_v21 }
 0xac5   :  { %1090 = vpow2.f32 %v514_v22 }
 0xacb   :  { %v1091_v23 = vpop.eup %1090 }
 0xacc   :  { %v516_v24 = vsel %vm239_vm1, %v1091_v23, 0.0 }
 0xacd   :  { %v517_v25 = vrot.slane %v516_v24, 4 }
 0xacf   :  { %v518_v26 = vadd.f32 %v517_v25, %v516_v24 }
 0xad1   :  { %v519_v27 = vrot.slane %v518_v26, 2 }
 0xad3   :  { %v520_v28 = vadd.f32 %v519_v27, %v518_v26 }
 0xad5   :  { %v521_v29 = vrot.slane %v520_v28, 1 }
 0xad7   :  { %v522_v30 = vadd.f32 %v521_v29, %v520_v28 }
 0xad9   :  { %1092 = vlog2.f32 %v522_v30 }
 0xadf   :  { %v1093_v31 = vpop.eup %1092 }
 0xae0   :  { %v524_v32 = vmul.f32 0.6931472, %v1093_v31 }
 0xae2   :  { %v525_v33 = vadd.f32 %v524_v32, %v512_v20 }
 0xae4   :  { %v526_v34 = vsub.f32 -2.0794415, %v525_v33 }
 0xae6   :  { %v527_v35 = vsub.f32 %v526_v34, %v1255_v14 }
 0xae8   :  { %v528_v36 = vsel %vm239_vm1, %v527_v35, -inf }
 0xae9   :  { %529 = vmax.xlane.f32.xlu2 %v528_v36 }
 0xb5c   :  { %v530_v37 = vpop.xlane.xlu2 %529 }
 0xb5d   :  { %v531_v38 = vsub.f32 %v527_v35, %v530_v37 }
 0xb5f   :  { %v532_v39 = vmul.f32 1.442695, %v531_v38 }
 0xb61   :  { %1094 = vpow2.f32 %v532_v39 }
 0xb67   :  { %v1095_v40 = vpop.eup %1094 }
 0xb68   :  { %v534_v41 = vsel %vm239_vm1, %v1095_v40, 0.0 }
 0xb69   :  { %535 = vadd.xlane.f32.xlu0 %v534_v41 }
 0xbdc   :  { %v536_v42 = vpop.xlane.xlu0 %535 }
 0xbdd   :  { %1096 = vlog2.f32 %v536_v42 }
 0xbe3   :  { %v1097_v43 = vpop.eup %1096 }
 0xbe4   :  { %v538_v44 = vmul.f32 0.6931472, %v1097_v43 }
 0xbe6   :  { %v539_v45 = vadd.f32 %v538_v44, %v530_v37 }
 0xbe8   :  { %v540_v46 = vsub.f32 -2.0794415, %v539_v45 }
 0xbea   :  { %v541_v47 = vsub.f32 %v540_v46, %v1255_v14 }
 0xbec   :  { %v542_v48 = vsel %vm239_vm1, %v541_v47, -inf }
 0xbed   :  { %v543_v49 = vrot.slane %v542_v48, 4 }
 0xbef   :  { %v544_v50 = vmax.f32 %v542_v48, %v543_v49 }
 0xbf1   :  { %v545_v51 = vrot.slane %v544_v50, 2 }
 0xbf3   :  { %v546_v52 = vmax.f32 %v544_v50, %v545_v51 }
 0xbf5   :  { %v547_v53 = vrot.slane %v546_v52, 1 }
 0xbf7   :  { %v548_v54 = vmax.f32 %v546_v52, %v547_v53 }
 0xbf9   :  { %v549_v55 = vsub.f32 %v541_v47, %v548_v54 }
 0xbfb   :  { %v550_v56 = vmul.f32 1.442695, %v549_v55 }
 0xbfd   :  { %1098 = vpow2.f32 %v550_v56 }
 0xc03   :  { %v1099_v57 = vpop.eup %1098 }
 0xc04   :  { %v552_v58 = vsel %vm239_vm1, %v1099_v57, 0.0 }
 0xc05   :  { %v553_v59 = vrot.slane %v552_v58, 4 }
 0xc07   :  { %v554_v60 = vadd.f32 %v553_v59, %v552_v58 }
 0xc09   :  { %v555_v61 = vrot.slane %v554_v60, 2 }
 0xc0b   :  { %v556_v62 = vadd.f32 %v555_v61, %v554_v60 }
 0xc0d   :  { %v557_v63 = vrot.slane %v556_v62, 1 }
 0xc0f   :  { %v558_v0 = vadd.f32 %v557_v63, %v556_v62 }
 0xc11   :  { %1100 = vlog2.f32 %v558_v0 }
 0xc17   :  { %v1101_v1 = vpop.eup %1100 }
 0xc18   :  { %v560_v2 = vmul.f32 0.6931472, %v1101_v1 }
 0xc1a   :  { %v561_v3 = vadd.f32 %v560_v2, %v548_v54 }
 0xc1c   :  { %v562_v4 = vsub.f32 -2.0794415, %v561_v3 }
 0xc1e   :  { %v563_v5 = vsub.f32 %v562_v4, %v1255_v14 }
 0xc20   :  { %v564_v6 = vsel %vm239_vm1, %v563_v5, -inf }
 0xc21   :  { %565 = vmax.xlane.f32.xlu2 %v564_v6 }
 0xc94   :  { %v566_v7 = vpop.xlane.xlu2 %565 }
 0xc95   :  { %v567_v8 = vsub.f32 %v563_v5, %v566_v7 }
 0xc97   :  { %v568_v9 = vmul.f32 1.442695, %v567_v8 }
 0xc99   :  { %1102 = vpow2.f32 %v568_v9 }
 0xc9f   :  { %v1103_v10 = vpop.eup %1102 }
 0xca0   :  { %v570_v11 = vsel %vm239_vm1, %v1103_v10, 0.0 }
 0xca1   :  { %571 = vadd.xlane.f32.xlu0 %v570_v11 }
 0xd14   :  { %v572_v12 = vpop.xlane.xlu0 %571 }
 0xd15   :  { %1104 = vlog2.f32 %v572_v12 }
 0xd1b   :  { %v1105_v13 = vpop.eup %1104 }
 0xd1c   :  { %v574_v15 = vmul.f32 0.6931472, %v1105_v13 }
 0xd1e   :  { %v575_v16 = vadd.f32 %v574_v15, %v566_v7 }
 0xd20   :  { %v576_v17 = vsub.f32 -2.0794415, %v575_v16 }
 0xd22   :  { %v577_v18 = vsub.f32 %v576_v17, %v1255_v14 }
 0xd24   :  { %v578_v19 = vsel %vm239_vm1, %v577_v18, -inf }
 0xd25   :  { %v579_v20 = vrot.slane %v578_v19, 4 }
 0xd27   :  { %v580_v21 = vmax.f32 %v578_v19, %v579_v20 }
 0xd29   :  { %v581_v22 = vrot.slane %v580_v21, 2 }
 0xd2b   :  { %v582_v23 = vmax.f32 %v580_v21, %v581_v22 }
 0xd2d   :  { %v583_v24 = vrot.slane %v582_v23, 1 }
 0xd2f   :  { %v584_v25 = vmax.f32 %v582_v23, %v583_v24 }
 0xd31   :  { %v585_v26 = vsub.f32 %v577_v18, %v584_v25 }
 0xd33   :  { %v586_v27 = vmul.f32 1.442695, %v585_v26 }
 0xd35   :  { %1106 = vpow2.f32 %v586_v27 }
 0xd3b   :  { %v1107_v28 = vpop.eup %1106 }
 0xd3c   :  { %v588_v29 = vsel %vm239_vm1, %v1107_v28, 0.0 }
 0xd3d   :  { %v589_v30 = vrot.slane %v588_v29, 4 }
 0xd3f   :  { %v590_v31 = vadd.f32 %v589_v30, %v588_v29 }
 0xd41   :  { %v591_v32 = vrot.slane %v590_v31, 2 }
 0xd43   :  { %v592_v33 = vadd.f32 %v591_v32, %v590_v31 }
 0xd45   :  { %v593_v34 = vrot.slane %v592_v33, 1 }
 0xd47   :  { %v594_v35 = vadd.f32 %v593_v34, %v592_v33 }
 0xd49   :  { %1108 = vlog2.f32 %v594_v35 }
 0xd4f   :  { %v1109_v36 = vpop.eup %1108 }
 0xd50   :  { %v596_v37 = vmul.f32 0.6931472, %v1109_v36 }
 0xd52   :  { %v597_v38 = vadd.f32 %v596_v37, %v584_v25 }
 0xd54   :  { %v598_v39 = vsub.f32 -2.0794415, %v597_v38 }
 0xd56   :  { %v599_v40 = vsub.f32 %v598_v39, %v1255_v14 }
 0xd58   :  { %v600_v41 = vsel %vm239_vm1, %v599_v40, -inf }
 0xd59   :  { %601 = vmax.xlane.f32.xlu2 %v600_v41 }
 0xdcc   :  { %v602_v42 = vpop.xlane.xlu2 %601 }
 0xdcd   :  { %v603_v43 = vsub.f32 %v599_v40, %v602_v42 }
 0xdcf   :  { %v604_v44 = vmul.f32 1.442695, %v603_v43 }
 0xdd1   :  { %1110 = vpow2.f32 %v604_v44 }
 0xdd7   :  { %v1111_v45 = vpop.eup %1110 }
 0xdd8   :  { %v606_v46 = vsel %vm239_vm1, %v1111_v45, 0.0 }
 0xdd9   :  { %607 = vadd.xlane.f32.xlu0 %v606_v46 }
 0xe4c   :  { %v608_v47 = vpop.xlane.xlu0 %607 }
 0xe4d   :  { %1112 = vlog2.f32 %v608_v47 }
 0xe53   :  { %v1113_v48 = vpop.eup %1112 }
 0xe54   :  { %v610_v49 = vmul.f32 0.6931472, %v1113_v48 }
 0xe56   :  { %v611_v50 = vadd.f32 %v610_v49, %v602_v42 }
 0xe58   :  { %v612_v51 = vsub.f32 -2.0794415, %v611_v50 }
 0xe5a   :  { %v613_v52 = vsub.f32 %v612_v51, %v1255_v14 }
 0xe5c   :  { %v614_v53 = vsel %vm239_vm1, %v613_v52, -inf }
 0xe5d   :  { %v615_v54 = vrot.slane %v614_v53, 4 }
 0xe5f   :  { %v616_v55 = vmax.f32 %v614_v53, %v615_v54 }
 0xe61   :  { %v617_v56 = vrot.slane %v616_v55, 2 }
 0xe63   :  { %v618_v57 = vmax.f32 %v616_v55, %v617_v56 }
 0xe65   :  { %v619_v58 = vrot.slane %v618_v57, 1 }
 0xe67   :  { %v620_v59 = vmax.f32 %v618_v57, %v619_v58 }
 0xe69   :  { %v621_v60 = vsub.f32 %v613_v52, %v620_v59 }
 0xe6b   :  { %v622_v61 = vmul.f32 1.442695, %v621_v60 }
 0xe6d   :  { %1114 = vpow2.f32 %v622_v61 }
 0xe73   :  { %v1115_v62 = vpop.eup %1114 }
 0xe74   :  { %v624_v63 = vsel %vm239_vm1, %v1115_v62, 0.0 }
 0xe75   :  { %v625_v0 = vrot.slane %v624_v63, 4 }
 0xe77   :  { %v626_v1 = vadd.f32 %v625_v0, %v624_v63 }
 0xe79   :  { %v627_v2 = vrot.slane %v626_v1, 2 }
 0xe7b   :  { %v628_v3 = vadd.f32 %v627_v2, %v626_v1 }
 0xe7d   :  { %v629_v4 = vrot.slane %v628_v3, 1 }
 0xe7f   :  { %v630_v5 = vadd.f32 %v629_v4, %v628_v3 }
 0xe81   :  { %1116 = vlog2.f32 %v630_v5 }
 0xe87   :  { %v1117_v6 = vpop.eup %1116 }
 0xe88   :  { %v632_v7 = vmul.f32 0.6931472, %v1117_v6 }
 0xe8a   :  { %v633_v8 = vadd.f32 %v632_v7, %v620_v59 }
 0xe8c   :  { %v634_v9 = vsub.f32 -2.0794415, %v633_v8 }
 0xe8e   :  { %v635_v10 = vsub.f32 %v634_v9, %v1255_v14 }
 0xe90   :  { %v636_v11 = vsel %vm239_vm1, %v635_v10, -inf }
 0xe91   :  { %637 = vmax.xlane.f32.xlu2 %v636_v11 }
 0xf04   :  { %v638_v12 = vpop.xlane.xlu2 %637 }
 0xf05   :  { %v639_v13 = vsub.f32 %v635_v10, %v638_v12 }
 0xf07   :  { %v640_v15 = vmul.f32 1.442695, %v639_v13 }
 0xf09   :  { %1118 = vpow2.f32 %v640_v15 }
 0xf0f   :  { %v1119_v16 = vpop.eup %1118 }
 0xf10   :  { %v642_v17 = vsel %vm239_vm1, %v1119_v16, 0.0 }
 0xf11   :  { %643 = vadd.xlane.f32.xlu0 %v642_v17 }
 0xf84   :  { %v644_v18 = vpop.xlane.xlu0 %643 }
 0xf85   :  { %1120 = vlog2.f32 %v644_v18 }
 0xf8b   :  { %v1121_v19 = vpop.eup %1120 }
 0xf8c   :  { %v646_v20 = vmul.f32 0.6931472, %v1121_v19 }
 0xf8e   :  { %v647_v21 = vadd.f32 %v646_v20, %v638_v12 }
 0xf90   :  { %v648_v22 = vsub.f32 -2.0794415, %v647_v21 }
 0xf92   :  { %v649_v23 = vsub.f32 %v648_v22, %v1255_v14 }
 0xf94   :  { %v650_v24 = vsel %vm239_vm1, %v649_v23, -inf }
 0xf95   :  { %v651_v25 = vrot.slane %v650_v24, 4 }
 0xf97   :  { %v652_v26 = vmax.f32 %v650_v24, %v651_v25 }
 0xf99   :  { %v653_v27 = vrot.slane %v652_v26, 2 }
 0xf9b   :  { %v654_v28 = vmax.f32 %v652_v26, %v653_v27 }
 0xf9d   :  { %v655_v29 = vrot.slane %v654_v28, 1 }
 0xf9f   :  { %v656_v30 = vmax.f32 %v654_v28, %v655_v29 }
 0xfa1   :  { %v657_v31 = vsub.f32 %v649_v23, %v656_v30 }
 0xfa3   :  { %v658_v32 = vmul.f32 1.442695, %v657_v31 }
 0xfa5   :  { %1122 = vpow2.f32 %v658_v32 }
 0xfab   :  { %v1123_v33 = vpop.eup %1122 }
 0xfac   :  { %v660_v34 = vsel %vm239_vm1, %v1123_v33, 0.0 }
 0xfad   :  { %v661_v35 = vrot.slane %v660_v34, 4 }
 0xfaf   :  { %v662_v36 = vadd.f32 %v661_v35, %v660_v34 }
 0xfb1   :  { %v663_v37 = vrot.slane %v662_v36, 2 }
 0xfb3   :  { %v664_v38 = vadd.f32 %v663_v37, %v662_v36 }
 0xfb5   :  { %v665_v39 = vrot.slane %v664_v38, 1 }
 0xfb7   :  { %v666_v40 = vadd.f32 %v665_v39, %v664_v38 }
 0xfb9   :  { %1124 = vlog2.f32 %v666_v40 }
 0xfbf   :  { %v1125_v41 = vpop.eup %1124 }
 0xfc0   :  { %v668_v42 = vmul.f32 0.6931472, %v1125_v41 }
 0xfc2   :  { %v669_v43 = vadd.f32 %v668_v42, %v656_v30 }
 0xfc4   :  { %v670_v44 = vsub.f32 -2.0794415, %v669_v43 }
 0xfc6   :  { %v671_v45 = vsub.f32 %v670_v44, %v1255_v14 }
 0xfc8   :  { %v672_v46 = vsel %vm239_vm1, %v671_v45, -inf }
 0xfc9   :  { %673 = vmax.xlane.f32.xlu2 %v672_v46 }
0x103c   :  { %v674_v47 = vpop.xlane.xlu2 %673 }
0x103d   :  { %v675_v48 = vsub.f32 %v671_v45, %v674_v47 }
0x103f   :  { %v676_v49 = vmul.f32 1.442695, %v675_v48 }
0x1041   :  { %1126 = vpow2.f32 %v676_v49 }
0x1047   :  { %v1127_v50 = vpop.eup %1126 }
0x1048   :  { %v678_v51 = vsel %vm239_vm1, %v1127_v50, 0.0 }
0x1049   :  { %679 = vadd.xlane.f32.xlu0 %v678_v51 }
0x10bc   :  { %v680_v52 = vpop.xlane.xlu0 %679 }
0x10bd   :  { %1128 = vlog2.f32 %v680_v52 }
0x10c3   :  { %v1129_v53 = vpop.eup %1128 }
0x10c4   :  { %v682_v54 = vmul.f32 0.6931472, %v1129_v53 }
0x10c6   :  { %v683_v55 = vadd.f32 %v682_v54, %v674_v47 }
0x10c8   :  { %v684_v56 = vsub.f32 -2.0794415, %v683_v55 }
0x10ca   :  { %v685_v57 = vsub.f32 %v684_v56, %v1255_v14 }
0x10cc   :  { %v686_v58 = vsel %vm239_vm1, %v685_v57, -inf }
0x10cd   :  { %v687_v59 = vrot.slane %v686_v58, 4 }
0x10cf   :  { %v688_v60 = vmax.f32 %v686_v58, %v687_v59 }
0x10d1   :  { %v689_v61 = vrot.slane %v688_v60, 2 }
0x10d3   :  { %v690_v62 = vmax.f32 %v688_v60, %v689_v61 }
0x10d5   :  { %v691_v63 = vrot.slane %v690_v62, 1 }
0x10d7   :  { %v692_v0 = vmax.f32 %v690_v62, %v691_v63 }
0x10d9   :  { %v693_v1 = vsub.f32 %v685_v57, %v692_v0 }
0x10db   :  { %v694_v2 = vmul.f32 1.442695, %v693_v1 }
0x10dd   :  { %1130 = vpow2.f32 %v694_v2 }
0x10e3   :  { %v1131_v3 = vpop.eup %1130 }
0x10e4   :  { %v696_v4 = vsel %vm239_vm1, %v1131_v3, 0.0 }
0x10e5   :  { %v697_v5 = vrot.slane %v696_v4, 4 }
0x10e7   :  { %v698_v6 = vadd.f32 %v697_v5, %v696_v4 }
0x10e9   :  { %v699_v7 = vrot.slane %v698_v6, 2 }
0x10eb   :  { %v700_v8 = vadd.f32 %v699_v7, %v698_v6 }
0x10ed   :  { %v701_v9 = vrot.slane %v700_v8, 1 }
0x10ef   :  { %v702_v10 = vadd.f32 %v701_v9, %v700_v8 }
0x10f1   :  { %1132 = vlog2.f32 %v702_v10 }
0x10f7   :  { %v1133_v11 = vpop.eup %1132 }
0x10f8   :  { %v704_v12 = vmul.f32 0.6931472, %v1133_v11 }
0x10fa   :  { %v705_v13 = vadd.f32 %v704_v12, %v692_v0 }
0x10fc   :  { %v706_v15 = vsub.f32 -2.0794415, %v705_v13 }
0x10fe   :  { %v707_v16 = vsub.f32 %v706_v15, %v1255_v14 }
0x1100   :  { %v708_v17 = vsel %vm239_vm1, %v707_v16, -inf }
0x1101   :  { %709 = vmax.xlane.f32.xlu1 %v708_v17 }
0x1174   :  { %v710_v18 = vpop.xlane.xlu1 %709 }
0x1175   :  { %v711_v19 = vsub.f32 %v707_v16, %v710_v18 }
0x1177   :  { %v712_v20 = vmul.f32 1.442695, %v711_v19 }
0x1179   :  { %1134 = vpow2.f32 %v712_v20 }
0x117f   :  { %v1135_v21 = vpop.eup %1134 }
0x1180   :  { %v714_v22 = vsel %vm239_vm1, %v1135_v21, 0.0 }
0x1181   :  { %715 = vadd.xlane.f32.xlu2 %v714_v22 }
0x11f4   :  { %v716_v23 = vpop.xlane.xlu2 %715 }
0x11f5   :  { %1136 = vlog2.f32 %v716_v23 }
0x11fb   :  { %v1137_v24 = vpop.eup %1136 }
0x11fc   :  { %v718_v25 = vmul.f32 0.6931472, %v1137_v24 }
0x11fe   :  { %v719_v26 = vadd.f32 %v718_v25, %v710_v18 }
0x1200   :  { %v720_v27 = vsub.f32 -2.0794415, %v719_v26 }
0x1202   :  { %v721_v28 = vsub.f32 %v720_v27, %v1255_v14 }
0x1204   :  { %v722_v29 = vsel %vm239_vm1, %v721_v28, -inf }
0x1205   :  { %v723_v30 = vrot.slane %v722_v29, 4 }
0x1207   :  { %v724_v31 = vmax.f32 %v722_v29, %v723_v30 }
0x1209   :  { %v725_v32 = vrot.slane %v724_v31, 2 }
0x120b   :  { %v726_v33 = vmax.f32 %v724_v31, %v725_v32 }
0x120d   :  { %v727_v34 = vrot.slane %v726_v33, 1 }
0x120f   :  { %v728_v35 = vmax.f32 %v726_v33, %v727_v34 }
0x1211   :  { %v729_v36 = vsub.f32 %v721_v28, %v728_v35 }
0x1213   :  { %v730_v37 = vmul.f32 1.442695, %v729_v36 }
0x1215   :  { %1138 = vpow2.f32 %v730_v37 }
0x121b   :  { %v1139_v38 = vpop.eup %1138 }
0x121c   :  { %v732_v39 = vsel %vm239_vm1, %v1139_v38, 0.0 }
0x121d   :  { %v733_v40 = vrot.slane %v732_v39, 4 }
0x121f   :  { %v734_v41 = vadd.f32 %v733_v40, %v732_v39 }
0x1221   :  { %v735_v42 = vrot.slane %v734_v41, 2 }
0x1223   :  { %v736_v43 = vadd.f32 %v735_v42, %v734_v41 }
0x1225   :  { %v737_v44 = vrot.slane %v736_v43, 1 }
0x1227   :  { %v738_v45 = vadd.f32 %v737_v44, %v736_v43 }
0x1229   :  { %1140 = vlog2.f32 %v738_v45 }
0x122f   :  { %v1141_v46 = vpop.eup %1140 }
0x1230   :  { %v740_v47 = vmul.f32 0.6931472, %v1141_v46 }
0x1232   :  { %v741_v48 = vadd.f32 %v740_v47, %v728_v35 }
0x1234   :  { %v742_v49 = vsub.f32 -2.0794415, %v741_v48 }
0x1236   :  { %v743_v50 = vsub.f32 %v742_v49, %v1255_v14 }
0x1238   :  { %v744_v51 = vsel %vm239_vm1, %v743_v50, -inf }
0x1239   :  { %745 = vmax.xlane.f32.xlu0 %v744_v51 }
0x12ac   :  { %v746_v52 = vpop.xlane.xlu0 %745 }
0x12ad   :  { %v747_v53 = vsub.f32 %v743_v50, %v746_v52 }
0x12af   :  { %v748_v54 = vmul.f32 1.442695, %v747_v53 }
0x12b1   :  { %1142 = vpow2.f32 %v748_v54 }
0x12b7   :  { %v1143_v55 = vpop.eup %1142 }
0x12b8   :  { %v750_v56 = vsel %vm239_vm1, %v1143_v55, 0.0 }
0x12b9   :  { %751 = vadd.xlane.f32.xlu1 %v750_v56 }
0x132c   :  { %v752_v57 = vpop.xlane.xlu1 %751 }
0x132d   :  { %1144 = vlog2.f32 %v752_v57 }
0x1333   :  { %v1145_v58 = vpop.eup %1144 }
0x1334   :  { %v754_v59 = vmul.f32 0.6931472, %v1145_v58 }
0x1336   :  { %v755_v60 = vadd.f32 %v754_v59, %v746_v52 }
0x1338   :  { %v756_v61 = vsub.f32 -2.0794415, %v755_v60 }
0x133a   :  { %v757_v62 = vsub.f32 %v756_v61, %v1255_v14 }
0x133c   :  { %v758_v63 = vsel %vm239_vm1, %v757_v62, -inf }
0x133d   :  { %v759_v0 = vrot.slane %v758_v63, 4 }
0x133f   :  { %v760_v1 = vmax.f32 %v758_v63, %v759_v0 }
0x1341   :  { %v761_v2 = vrot.slane %v760_v1, 2 }
0x1343   :  { %v762_v3 = vmax.f32 %v760_v1, %v761_v2 }
0x1345   :  { %v763_v4 = vrot.slane %v762_v3, 1 }
0x1347   :  { %v764_v5 = vmax.f32 %v762_v3, %v763_v4 }
0x1349   :  { %v765_v6 = vsub.f32 %v757_v62, %v764_v5 }
0x134b   :  { %v766_v7 = vmul.f32 1.442695, %v765_v6 }
0x134d   :  { %1146 = vpow2.f32 %v766_v7 }
0x1353   :  { %v1147_v8 = vpop.eup %1146 }
0x1354   :  { %v768_v9 = vsel %vm239_vm1, %v1147_v8, 0.0 }
0x1355   :  { %v769_v10 = vrot.slane %v768_v9, 4 }
0x1357   :  { %v770_v11 = vadd.f32 %v769_v10, %v768_v9 }
0x1359   :  { %v771_v12 = vrot.slane %v770_v11, 2 }
0x135b   :  { %v772_v13 = vadd.f32 %v771_v12, %v770_v11 }
0x135d   :  { %v773_v15 = vrot.slane %v772_v13, 1 }
0x135f   :  { %v774_v16 = vadd.f32 %v773_v15, %v772_v13 }
0x1361   :  { %1148 = vlog2.f32 %v774_v16 }
0x1367   :  { %v1149_v17 = vpop.eup %1148 }
0x1368   :  { %v776_v18 = vmul.f32 0.6931472, %v1149_v17 }
0x136a   :  { %v777_v19 = vadd.f32 %v776_v18, %v764_v5 }
0x136c   :  { %v778_v20 = vsub.f32 -2.0794415, %v777_v19 }
0x136e   :  { %v779_v21 = vsub.f32 %v778_v20, %v1255_v14 }
0x1370   :  { %v780_v22 = vsel %vm239_vm1, %v779_v21, -inf }
0x1371   :  { %781 = vmax.xlane.f32.xlu2 %v780_v22 }
0x13e4   :  { %v782_v23 = vpop.xlane.xlu2 %781 }
0x13e5   :  { %v783_v24 = vsub.f32 %v779_v21, %v782_v23 }
0x13e7   :  { %v784_v25 = vmul.f32 1.442695, %v783_v24 }
0x13e9   :  { %1150 = vpow2.f32 %v784_v25 }
0x13ef   :  { %v1151_v26 = vpop.eup %1150 }
0x13f0   :  { %v786_v27 = vsel %vm239_vm1, %v1151_v26, 0.0 }
0x13f1   :  { %787 = vadd.xlane.f32.xlu0 %v786_v27 }
0x1464   :  { %v788_v28 = vpop.xlane.xlu0 %787 }
0x1465   :  { %1152 = vlog2.f32 %v788_v28 }
0x146b   :  { %v1153_v29 = vpop.eup %1152 }
0x146c   :  { %v790_v30 = vmul.f32 0.6931472, %v1153_v29 }
0x146e   :  { %v791_v31 = vadd.f32 %v790_v30, %v782_v23 }
0x1470   :  { %v792_v32 = vsub.f32 -2.0794415, %v791_v31 }
0x1472   :  { %v793_v33 = vsub.f32 %v792_v32, %v1255_v14 }
0x1474   :  { %v794_v34 = vsel %vm239_vm1, %v793_v33, -inf }
0x1475   :  { %v795_v35 = vrot.slane %v794_v34, 4 }
0x1477   :  { %v796_v36 = vmax.f32 %v794_v34, %v795_v35 }
0x1479   :  { %v797_v37 = vrot.slane %v796_v36, 2 }
0x147b   :  { %v798_v38 = vmax.f32 %v796_v36, %v797_v37 }
0x147d   :  { %v799_v39 = vrot.slane %v798_v38, 1 }
0x147f   :  { %v800_v40 = vmax.f32 %v798_v38, %v799_v39 }
0x1481   :  { %v801_v41 = vsub.f32 %v793_v33, %v800_v40 }
0x1483   :  { %v802_v42 = vmul.f32 1.442695, %v801_v41 }
0x1485   :  { %1154 = vpow2.f32 %v802_v42 }
0x148b   :  { %v1155_v43 = vpop.eup %1154 }
0x148c   :  { %v804_v44 = vsel %vm239_vm1, %v1155_v43, 0.0 }
0x148d   :  { %v805_v45 = vrot.slane %v804_v44, 4 }
0x148f   :  { %v806_v46 = vadd.f32 %v805_v45, %v804_v44 }
0x1491   :  { %v807_v47 = vrot.slane %v806_v46, 2 }
0x1493   :  { %v808_v48 = vadd.f32 %v807_v47, %v806_v46 }
0x1495   :  { %v809_v49 = vrot.slane %v808_v48, 1 }
0x1497   :  { %v810_v50 = vadd.f32 %v809_v49, %v808_v48 }
0x1499   :  { %1156 = vlog2.f32 %v810_v50 }
0x149f   :  { %v1157_v51 = vpop.eup %1156 }
0x14a0   :  { %v812_v52 = vmul.f32 0.6931472, %v1157_v51 }
0x14a2   :  { %v813_v53 = vadd.f32 %v812_v52, %v800_v40 }
0x14a4   :  { %v814_v54 = vsub.f32 -2.0794415, %v813_v53 }
0x14a6   :  { %v815_v55 = vsub.f32 %v814_v54, %v1255_v14 }
0x14a8   :  { %v816_v56 = vsel %vm239_vm1, %v815_v55, -inf }
0x14a9   :  { %817 = vmax.xlane.f32.xlu1 %v816_v56 }
0x151c   :  { %v818_v57 = vpop.xlane.xlu1 %817 }
0x151d   :  { %v819_v58 = vsub.f32 %v815_v55, %v818_v57 }
0x151f   :  { %v820_v59 = vmul.f32 1.442695, %v819_v58 }
0x1521   :  { %1158 = vpow2.f32 %v820_v59 }
0x1527   :  { %v1159_v60 = vpop.eup %1158 }
0x1528   :  { %v822_v61 = vsel %vm239_vm1, %v1159_v60, 0.0 }
0x1529   :  { %823 = vadd.xlane.f32.xlu2 %v822_v61 }
0x159c   :  { %v824_v62 = vpop.xlane.xlu2 %823 }
0x159d   :  { %1160 = vlog2.f32 %v824_v62  ;;  %v1370_v62 = vld [vmem:[%s1414_s0] sm:$0xff] }
0x15a3   :  { %v1161_v63 = vpop.eup %1160 }
0x15a4   :  { %v826_v0 = vmul.f32 0.6931472, %v1161_v63  ;;  %v30_v63 = vsel %vm29_vm0, %v1370_v62, 0.0 }
0x15a6   :  { %v827_v1 = vadd.f32 %v826_v0, %v818_v57  ;;  %v1209_v0 = vmov 8.0  }
0x15a8   :  { %v828_v2 = vsub.f32 -2.0794415, %v827_v1  ;;  %v31_v1 = vrot.slane %v30_v63, 4 }
0x15aa   :  { %v829_v3 = vsub.f32 %v828_v2, %v1255_v14 }
0x15ac   :  { %v830_v4 = vsel %vm239_vm1, %v829_v3, -inf }
0x15ad   :  { %v831_v5 = vrot.slane %v830_v4, 4 }
0x15af   :  { %v832_v6 = vmax.f32 %v830_v4, %v831_v5  ;;  %v32_v4 = vadd.f32 %v31_v1, %v30_v63 }
0x15b1   :  { %v833_v7 = vrot.slane %v832_v6, 2 }
0x15b3   :  { %v834_v8 = vmax.f32 %v832_v6, %v833_v7  ;;  %v33_v7 = vrot.slane %v32_v4, 2 }
0x15b5   :  { %v835_v9 = vrot.slane %v834_v8, 1 }
0x15b7   :  { %v836_v10 = vmax.f32 %v834_v8, %v835_v9 }
0x15b9   :  { %v837_v11 = vsub.f32 %v829_v3, %v836_v10  ;;  %v24_v3 = vld [vmem:[%s1416_s1] sm:$0x3] }
0x15ba   :  { %v61_v5 = vmul.f32 %v24_v3, %v24_v3 }
0x15bb   :  { %v838_v12 = vmul.f32 1.442695, %v837_v11 }
0x15bc   :  { %v63_v8 = vsel %vm62_vm2, %v61_v5, 0.0 }
0x15bd   :  { %1162 = vpow2.f32 %v838_v12 }
0x15c3   :  { %v1163_v13 = vpop.eup %1162 }
0x15c4   :  { %v840_v15 = vsel %vm239_vm1, %v1163_v13, 0.0 }
0x15c5   :  { %v841_v16 = vrot.slane %v840_v15, 4 }
0x15c7   :  { %v842_v17 = vadd.f32 %v841_v16, %v840_v15 }
0x15c9   :  { %v843_v18 = vrot.slane %v842_v17, 2 }
0x15cb   :  { %v844_v19 = vadd.f32 %v843_v18, %v842_v17 }
0x15cd   :  { %v845_v20 = vrot.slane %v844_v19, 1 }
0x15cf   :  { %v846_v21 = vadd.f32 %v845_v20, %v844_v19 }
0x15d1   :  { %1164 = vlog2.f32 %v846_v21 }
0x15d7   :  { %v1165_v22 = vpop.eup %1164 }
0x15d8   :  { %v848_v23 = vmul.f32 0.6931472, %v1165_v22 }
0x15da   :  { %v849_v24 = vadd.f32 %v848_v23, %v836_v10  ;;  %v34_v10 = vadd.f32 %v33_v7, %v32_v4 }
0x15dc   :  { %v850_v25 = vsub.f32 -2.0794415, %v849_v24  ;;  %v35_v12 = vrot.slane %v34_v10, 1  ;;  %v1382_v24 = vld [vmem:[%s1417_s2] sm:$0x7] }
0x15de   :  { %v851_v26 = vsub.f32 %v850_v25, %v1255_v14  ;;  %v36_v15 = vadd.f32 %v35_v12, %v34_v10 }
0x15e0   :  { %v852_v27 = vsel %vm239_vm1, %v851_v26, -inf }
0x15e1   :  { %853 = vmax.xlane.f32.xlu0 %v852_v27 }
0x1654   :  { %v854_v28 = vpop.xlane.xlu0 %853 }
0x1655   :  { %v855_v29 = vsub.f32 %v851_v26, %v854_v28  ;;  %v78_v26 = vmul.f32 %v1382_v24, %v1382_v24 }
0x1657   :  { %v856_v30 = vmul.f32 1.442695, %v855_v29  ;;  %v80_v27 = vsel %vm79_vm4, %v78_v26, 0.0 }
0x1659   :  { %1166 = vpow2.f32 %v856_v30 }
0x165f   :  { %v1167_v31 = vpop.eup %1166 }
0x1660   :  { %v858_v32 = vsel %vm239_vm1, %v1167_v31, 0.0 }
0x1661   :  { %859 = vadd.xlane.f32.xlu1 %v858_v32 }
0x16d4   :  { %v860_v33 = vpop.xlane.xlu1 %859 }
0x16d5   :  { %1168 = vlog2.f32 %v860_v33 }
0x16db   :  { %v1169_v34 = vpop.eup %1168 }
0x16dc   :  { %v862_v35 = vmul.f32 0.6931472, %v1169_v34 }
0x16de   :  { %v863_v36 = vadd.f32 %v862_v35, %v854_v28 }
0x16e0   :  { %v864_v37 = vsub.f32 -2.0794415, %v863_v36 }
0x16e2   :  { %v865_v38 = vsub.f32 %v864_v37, %v1255_v14 }
0x16e4   :  { %v866_v39 = vsel %vm239_vm1, %v865_v38, -inf }
0x16e5   :  { %v867_v40 = vrot.slane %v866_v39, 4 }
0x16e7   :  { %v868_v41 = vmax.f32 %v866_v39, %v867_v40 }
0x16e9   :  { %v869_v42 = vrot.slane %v868_v41, 2 }
0x16eb   :  { %v870_v43 = vmax.f32 %v868_v41, %v869_v42 }
0x16ed   :  { %v871_v44 = vrot.slane %v870_v43, 1 }
0x16ef   :  { %v872_v45 = vmax.f32 %v870_v43, %v871_v44 }
0x16f1   :  { %v873_v46 = vsub.f32 %v865_v38, %v872_v45 }
0x16f3   :  { %v874_v47 = vmul.f32 1.442695, %v873_v46 }
0x16f5   :  { %1170 = vpow2.f32 %v874_v47 }
0x16fb   :  { %v1171_v48 = vpop.eup %1170 }
0x16fc   :  { %v876_v49 = vsel %vm239_vm1, %v1171_v48, 0.0 }
0x16fd   :  { %v877_v50 = vrot.slane %v876_v49, 4 }
0x16ff   :  { %v878_v51 = vadd.f32 %v877_v50, %v876_v49 }
0x1701   :  { %v879_v52 = vrot.slane %v878_v51, 2 }
0x1703   :  { %v880_v53 = vadd.f32 %v879_v52, %v878_v51 }
0x1705   :  { %v881_v54 = vrot.slane %v880_v53, 1 }
0x1707   :  { %v882_v55 = vadd.f32 %v881_v54, %v880_v53 }
0x1709   :  { %1172 = vlog2.f32 %v882_v55 }
0x170a   :  { %1174 = vrcp.f32 %v1209_v0 }
0x170f   :  { %v1173_v56 = vpop.eup %1172 }
0x1710   :  { %v884_v57 = vmul.f32 0.6931472, %v1173_v56  ;;  %v1175_v2 = vpop.eup %1174 }
0x1711   :  { %v38_v6 = vmul.f32 8.0, %v1175_v2  ;;  %vm42_vm3 = vweird.f32 %v1175_v2 }
0x1712   :  { %v885_v58 = vadd.f32 %v884_v57, %v872_v45 }
0x1713   :  { %v39_v9 = vsub.f32 1.0, %v38_v6 }
0x1714   :  { %v886_v59 = vsub.f32 -2.0794415, %v885_v58 }
0x1715   :  { %v40_v11 = vmul.f32 %v1175_v2, %v39_v9 }
0x1716   :  { %v887_v60 = vsub.f32 %v886_v59, %v1255_v14 }
0x1717   :  { %v41_v13 = vadd.f32 %v1175_v2, %v40_v11 }
0x1718   :  { %v888_v61 = vsel %vm239_vm1, %v887_v60, -inf }
0x1719   :  { %889 = vmax.xlane.f32.xlu2 %v888_v61  ;;  %v43_v16 = vsel %vm42_vm3, %v1175_v2, %v41_v13  ;;  %vm143_vm3 = vcmask 2048  }
0x171a   :  { %v44_v17 = vmul.f32 %v43_v16, %v36_v15 }
0x171c   :  { %v45_v18 = vmul.f32 %v44_v17, %v44_v17 }
0x171e   :  { %v46_v19 = vsel %vm29_vm0, %v45_v18, 0.0 }
0x171f   :  { %47 = vadd.xlane.f32.xlu1 %v46_v19 }
0x1721   :  { %64 = vadd.xlane.f32.xlu2 %v63_v8 }
0x178c   :  { %v890_v20 = vpop.xlane.xlu2 %889 }
0x178d   :  { %v891_v21 = vsub.f32 %v887_v60, %v890_v20 }
0x178f   :  { %v892_v22 = vmul.f32 1.442695, %v891_v21 }
0x1791   :  { %1176 = vpow2.f32 %v892_v22 }
0x1792   :  { %v48_v29 = vpop.xlane.xlu1 %47 }
0x1793   :  { %v49_v31 = vadd.f32 1e-08, %v48_v29 }
0x1794   :  { %v65_v28 = vpop.xlane.xlu2 %64 }
0x1795   :  { %v66_v30 = vadd.f32 1e-08, %v65_v28  ;;  %vm56_vm7 = vweird.f32 %v49_v31 }
0x1797   :  { %v1177_v23 = vpop.eup %1176  ;;  %1178 = vrsqrt.f32 %v66_v30  ;;  %vm73_vm5 = vweird.f32 %v66_v30 }
0x1798   :  { %v894_v25 = vsel %vm239_vm1, %v1177_v23, 0.0  ;;  %1180 = vrsqrt.f32 %v49_v31 }
0x1799   :  { %895 = vadd.xlane.f32.xlu0 %v894_v25 }
0x179d   :  { %v1179_v32 = vpop.eup %1178 }
0x179e   :  { %v1181_v33 = vpop.eup %1180  ;;  %v68_v34 = vmul.f32 %v1179_v32, %v66_v30  ;;  %vm74_vm6 = vweird.f32 %v1179_v32 }
0x179f   :  { %v51_v35 = vmul.f32 %v1181_v33, %v49_v31  ;;  %vm57_vm8 = vweird.f32 %v1181_v33  ;;  %vm75_vm9 = vmor %vm73_vm5, %vm74_vm6 }
0x17a0   :  { %v69_v36 = vmul.f32 %v1179_v32, %v68_v34  ;;  %vm58_vm10 = vmor %vm56_vm7, %vm57_vm8 }
0x17a1   :  { %81 = vadd.xlane.f32.xlu0 %v80_v27  ;;  %v52_v37 = vmul.f32 %v1181_v33, %v51_v35 }
0x17a2   :  { %v70_v38 = vmul.f32 0.5, %v69_v36 }
0x17a3   :  { %v53_v39 = vmul.f32 0.5, %v52_v37 }
0x17a4   :  { %v71_v40 = vsub.f32 1.5, %v70_v38 }
0x17a5   :  { %v54_v42 = vsub.f32 1.5, %v53_v39 }
0x17a6   :  { %v72_v43 = vmul.f32 %v1179_v32, %v71_v40 }
0x17a7   :  { %v55_v44 = vmul.f32 %v1181_v33, %v54_v42 }
0x17a8   :  { %v76_v45 = vsel %vm75_vm9, %v1179_v32, %v72_v43 }
0x17a9   :  { %v59_v46 = vsel %vm58_vm10, %v1181_v33, %v55_v44  ;;  %v77_v47 = vmul.f32 %v76_v45, %v24_v3 }
0x17aa   :  { %v60_v48 = vmul.f32 %v59_v46, %v44_v17 }
0x17ac   :  { %v95_v50 = vmul.f32 %v77_v47, %v60_v48 }
0x17ae   :  { %v96_v54 = vsel %vm62_vm2, %v95_v50, 0.0  ;;  %vm128_vm2 = vcmask 1024  }
0x17af   :  { %97 = vadd.xlane.f32.xlu1 %v96_v54 }
0x180c   :  { %v896_v41 = vpop.xlane.xlu0 %895 }
0x180d   :  { %1182 = vlog2.f32 %v896_v41 }
0x1813   :  { %v1183_v49 = vpop.eup %1182 }
0x1814   :  { %v898_v51 = vmul.f32 0.6931472, %v1183_v49  ;;  %v82_v52 = vpop.xlane.xlu0 %81 }
0x1815   :  { %v83_v53 = vadd.f32 1e-08, %v82_v52 }
0x1816   :  { %v899_v55 = vadd.f32 %v898_v51, %v890_v20 }
0x1817   :  { %1184 = vrsqrt.f32 %v83_v53  ;;  %vm90_vm11 = vweird.f32 %v83_v53 }
0x1818   :  { %v900_v56 = vsub.f32 -2.0794415, %v899_v55 }
0x181a   :  { %v901_v57 = vsub.f32 %v900_v56, %v1255_v14 }
0x181c   :  { %v902_v58 = vsel %vm239_vm1, %v901_v57, -inf }
0x181d   :  { %v1185_v59 = vpop.eup %1184  ;;  %v903_v60 = vrot.slane %v902_v58, 4 }
0x181e   :  { %v85_v61 = vmul.f32 %v1185_v59, %v83_v53  ;;  %vm91_vm12 = vweird.f32 %v1185_v59 }
0x181f   :  { %v904_v63 = vmax.f32 %v902_v58, %v903_v60  ;;  %vm92_vm13 = vmor %vm90_vm11, %vm91_vm12 }
0x1820   :  { %v86_v0 = vmul.f32 %v1185_v59, %v85_v61 }
0x1821   :  { %v905_v1 = vrot.slane %v904_v63, 2 }
0x1822   :  { %v87_v2 = vmul.f32 0.5, %v86_v0  ;;  %v98_v29 = vpop.xlane.xlu1 %97 }
0x1823   :  { %v906_v3 = vmax.f32 %v904_v63, %v905_v1  ;;  %v99_v30 = vmul.f32 10.0, %v98_v29 }
0x1824   :  { %v88_v4 = vsub.f32 1.5, %v87_v2 }
0x1825   :  { %v907_v5 = vrot.slane %v906_v3, 1  ;;  %v106_v31 = vsel %vm105_vm14, %v99_v30, -inf }
0x1826   :  { %v89_v6 = vmul.f32 %v1185_v59, %v88_v4  ;;  %v107_v32 = vrot.slane %v106_v31, 4 }
0x1827   :  { %v908_v7 = vmax.f32 %v906_v3, %v907_v5 }
0x1828   :  { %v93_v8 = vsel %vm92_vm13, %v1185_v59, %v89_v6  ;;  %v108_v33 = vmax.f32 %v106_v31, %v107_v32 }
0x1829   :  { %v94_v9 = vmul.f32 %v93_v8, %v1382_v24  ;;  %v909_v10 = vsub.f32 %v901_v57, %v908_v7  ;;  %v26_v57 = vld [vmem:[%s1418_s3] sm:$0x7] }
0x182a   :  { %v109_v34 = vrot.slane %v108_v33, 2 }
0x182b   :  { %v100_v11 = vmul.f32 %v94_v9, %v60_v48  ;;  %v910_v12 = vmul.f32 1.442695, %v909_v10 }
0x182c   :  { %v110_v35 = vmax.f32 %v108_v33, %v109_v34 }
0x182d   :  { %v101_v13 = vsel %vm79_vm4, %v100_v11, 0.0  ;;  %1186 = vpow2.f32 %v910_v12 }
0x182e   :  { %102 = vadd.xlane.f32.xlu2 %v101_v13  ;;  %v111_v36 = vrot.slane %v110_v35, 1 }
0x1830   :  { %v112_v37 = vmax.f32 %v110_v35, %v111_v36 }
0x1832   :  { %1011 = vpush %v112_v37 }
0x1833   :  { %v1187_v15 = vpop.eup %1186 }
0x1834   :  { %v912_v16 = vsel %vm239_vm1, %v1187_v15, 0.0 }
0x1835   :  { %v913_v17 = vrot.slane %v912_v16, 4 }
0x1837   :  { %v914_v18 = vadd.f32 %v913_v17, %v912_v16 }
0x1839   :  { %v915_v19 = vrot.slane %v914_v18, 2 }
0x183b   :  { %v916_v20 = vadd.f32 %v915_v19, %v914_v18 }
0x183d   :  { %v917_v21 = vrot.slane %v916_v20, 1 }
0x183f   :  { %v918_v22 = vadd.f32 %v917_v21, %v916_v20 }
0x1841   :  { %1188 = vlog2.f32 %v918_v22 }
0x1847   :  { %v1189_v23 = vpop.eup %1188 }
0x1848   :  { %v920_v25 = vmul.f32 0.6931472, %v1189_v23  ;;  %v1029_v23 = vld [vmem:[%s1419_s5] ss:$0 sm:$0xff] }
0x184a   :  { %v921_v24 = vadd.f32 %v920_v25, %v908_v7 }
0x184c   :  { %v922_v26 = vsub.f32 -2.0794415, %v921_v24 }
0x184e   :  { %v923_v27 = vsub.f32 %v922_v26, %v1255_v14 }
0x1850   :  { %v924_v28 = vsel %vm239_vm1, %v923_v27, -inf }
0x1851   :  { %925 = vmax.xlane.f32.xlu0 %v924_v28  ;;  %v978_v28 = vsub.f32 %v1370_v62, %v1029_v23 }
0x1853   :  { %v979_v32 = vmul.f32 %v978_v28, %v978_v28 }
0x1855   :  { %v980_v36 = vsel %vm29_vm0, %v979_v32, 0.0 }
0x1863   :  { %s1012_s2 = spop %1011 }
0x18a1   :  { %v103_v38 = vpop.xlane.xlu2 %102 }
0x18a2   :  { %v104_v39 = vmul.f32 10.0, %v103_v38 }
0x18a4   :  { %v115_v40 = vsel %vm114_vm15, %v104_v39, -inf }
0x18a5   :  { %v116_v41 = vrot.slane %v115_v40, 4 }
0x18a7   :  { %v117_v42 = vmax.f32 %v115_v40, %v116_v41 }
0x18a9   :  { %v118_v43 = vrot.slane %v117_v42, 2 }
0x18ab   :  { %v119_v44 = vmax.f32 %v117_v42, %v118_v43 }
0x18ad   :  { %v120_v45 = vrot.slane %v119_v44, 1 }
0x18af   :  { %v121_v46 = vmax.f32 %v119_v44, %v120_v45 }
0x18b1   :  { %1013 = vpush %v121_v46 }
0x18c4   :  { %v926_v47 = vpop.xlane.xlu0 %925 }
0x18c5   :  { %v927_v48 = vsub.f32 %v923_v27, %v926_v47 }
0x18c7   :  { %v928_v49 = vmul.f32 1.442695, %v927_v48 }
0x18c9   :  { %1190 = vpow2.f32 %v928_v49 }
0x18cf   :  { %v1191_v50 = vpop.eup %1190 }
0x18d0   :  { %v930_v51 = vsel %vm239_vm1, %v1191_v50, 0.0 }
0x18d1   :  { %931 = vadd.xlane.f32.xlu1 %v930_v51 }
0x18e2   :  { %s1014_s28 = spop %1013 }
0x18e3   :  { %s123_s29 = smax.f32 %s1014_s28, %s1012_s2 }
0x18e4   :  { %v124_v52 = vstv %s123_s29 }
0x18e5   :  { %v125_v53 = vsub.f32 %v99_v30, %v124_v52  ;;  %v139_v54 = vsub.f32 %v104_v39, %v124_v52 }
0x18e7   :  { %v126_v55 = vmul.f32 1.442695, %v125_v53  ;;  %v140_v56 = vmul.f32 1.442695, %v139_v54 }
0x18e9   :  { %1192 = vpow2.f32 %v126_v55 }
0x18ea   :  { %1194 = vpow2.f32 %v140_v56 }
0x18ef   :  { %v1193_v58 = vpop.eup %1192 }
0x18f0   :  { %v1195_v59 = vpop.eup %1194  ;;  %v129_v60 = vsel %vm128_vm2, %v1193_v58, 0.0 }
0x18f1   :  { %v142_v61 = vmul.f32 %v1195_v59, %v26_v57  ;;  %130 = vadd.xlane.f32.xlu2 %v129_v60 }
0x18f3   :  { %v144_v63 = vsel %vm143_vm3, %v142_v61, 0.0 }
0x18f4   :  { %145 = vadd.xlane.f32.xlu0 %v144_v63 }
0x18f9   :  { %981 = vadd.xlane.f32.xlu2 %v980_v36 }
0x1944   :  { %v932_v0 = vpop.xlane.xlu1 %931 }
0x1945   :  { %1196 = vlog2.f32 %v932_v0 }
0x194b   :  { %v1197_v1 = vpop.eup %1196 }
0x194c   :  { %v934_v2 = vmul.f32 0.6931472, %v1197_v1 }
0x194e   :  { %v935_v3 = vadd.f32 %v934_v2, %v926_v47 }
0x1950   :  { %v936_v4 = vsub.f32 -2.0794415, %v935_v3 }
0x1952   :  { %v937_v5 = vsub.f32 %v936_v4, %v1255_v14 }
0x1954   :  { %v938_v6 = vsel %vm239_vm1, %v937_v5, -inf }
0x1955   :  { %v939_v7 = vrot.slane %v938_v6, 4 }
0x1957   :  { %v940_v8 = vmax.f32 %v938_v6, %v939_v7  ;;  %v991_v7 = vlaneseq }
0x1959   :  { %v941_v9 = vrot.slane %v940_v8, 2 }
0x195b   :  { %v942_v10 = vmax.f32 %v940_v8, %v941_v9  ;;  %v992_v8 = vand.u32 127, %v991_v7 }
0x195d   :  { %v943_v11 = vrot.slane %v942_v10, 1  ;;  %vm993_vm0 = vcmp.eq.s32.totalorder %v992_v8, 0  ;;  %vm1000_vm4 = vcmp.eq.s32.totalorder %v992_v8, 2 }
0x195f   :  { %v944_v12 = vmax.f32 %v942_v10, %v943_v11 }
0x1961   :  { %v945_v13 = vsub.f32 %v937_v5, %v944_v12 }
0x1963   :  { %v946_v15 = vmul.f32 1.442695, %v945_v13 }
0x1964   :  { %v131_v16 = vpop.xlane.xlu2 %130 }
0x1965   :  { %1198 = vpow2.f32 %v946_v15  ;;  %v132_v17 = vrot.slane %v131_v16, 4 }
0x1967   :  { %v146_v18 = vpop.xlane.xlu0 %145  ;;  %v133_v19 = vadd.f32 %v132_v17, %v131_v16 }
0x1968   :  { %v147_v20 = vrot.slane %v146_v18, 4 }
0x1969   :  { %v134_v21 = vrot.slane %v133_v19, 2 }
0x196a   :  { %v148_v22 = vadd.f32 %v147_v20, %v146_v18 }
0x196b   :  { %v1199_v25 = vpop.eup %1198  ;;  %v135_v24 = vadd.f32 %v134_v21, %v133_v19 }
0x196c   :  { %v948_v26 = vsel %vm239_vm1, %v1199_v25, 0.0  ;;  %v149_v27 = vrot.slane %v148_v22, 2  ;;  %v982_v57 = vpop.xlane.xlu2 %981 }
0x196d   :  { %v949_v29 = vrot.slane %v948_v26, 4  ;;  %v136_v30 = vrot.slane %v135_v24, 1 }
0x196e   :  { %v150_v31 = vadd.f32 %v149_v27, %v148_v22 }
0x196f   :  { %v950_v33 = vadd.f32 %v949_v29, %v948_v26  ;;  %v137_v34 = vadd.f32 %v136_v30, %v135_v24 }
0x1970   :  { %v151_v35 = vrot.slane %v150_v31, 1 }
0x1971   :  { %v951_v37 = vrot.slane %v950_v33, 2  ;;  %1015 = vpush %v137_v34 }
0x1972   :  { %v152_v38 = vadd.f32 %v151_v35, %v150_v31 }
0x1973   :  { %v952_v39 = vadd.f32 %v951_v37, %v950_v33 }
0x1974   :  { %1017 = vpush %v152_v38 }
0x1975   :  { %v953_v40 = vrot.slane %v952_v39, 1 }
0x1977   :  { %v954_v41 = vadd.f32 %v953_v40, %v952_v39 }
0x1979   :  { %1200 = vlog2.f32 %v954_v41 }
0x197f   :  { %v1201_v42 = vpop.eup %1200 }
0x1980   :  { %v956_v62 = vmul.f32 0.6931472, %v1201_v42 }
0x1982   :  { %v957_v43 = vadd.f32 %v956_v62, %v944_v12 }
0x1984   :  { %v958_v44 = vsub.f32 -2.0794415, %v957_v43 }
0x1986   :  { %v959_v45 = vadd.f32 %v958_v44, %v936_v4 }
0x1988   :  { %v960_v46 = vsub.f32 %v959_v45, %v1255_v14 }
0x198a   :  { %v961_v47 = vmul.f32 1.442695, %v960_v46 }
0x198c   :  { %1202 = vpow2.f32 %v961_v47 }
0x1992   :  { %v1203_v48 = vpop.eup %1202 }
0x1993   :  { %v963_v49 = vmul.f32 %v1203_v48, %v1255_v14  ;;  %v983_v14 = vrot.slane %v982_v57, 4 }
0x1995   :  { %v964_v50 = vsel %vm239_vm1, %v963_v49, 0.0  ;;  %v984_v58 = vadd.f32 %v983_v14, %v982_v57  ;;  %vm996_vm1 = vcmp.eq.s32.totalorder %v992_v8, 1 }
0x1996   :  { %965 = vadd.xlane.f32.xlu1 %v964_v50 }
0x1997   :  { %v985_v59 = vrot.slane %v984_v58, 2 }
0x1999   :  { %v986_v0 = vadd.f32 %v985_v59, %v984_v58 }
0x199b   :  { %v987_v3 = vrot.slane %v986_v0, 1 }
0x199d   :  { %v988_v6 = vadd.f32 %v987_v3, %v986_v0 }
0x19a2   :  { %s1016_s5 = spop %1015 }
0x19a3   :  { %s154_s9 = sadd.f32 1e-12, %s1016_s5 }
0x19a5   :  { %v155_v51 = vstv %s154_s9  ;;  %s1018_s10 = spop %1017 }
0x19a6   :  { %1204 = vlog2.f32 %v155_v51  ;;  %s159_s11 = sadd.f32 %s1018_s10, %s1016_s5 }
0x19a8   :  { %s160_s12 = sadd.f32 1e-12, %s159_s11 }
0x19aa   :  { %v161_v52 = vstv %s160_s12 }
0x19ab   :  { %1206 = vlog2.f32 %v161_v52 }
0x19ac   :  { %v1205_v53 = vpop.eup %1204 }
0x19ad   :  { %v157_v54 = vmul.f32 0.6931472, %v1205_v53 }
0x19af   :  { %1019 = vpush %v157_v54 }
0x19b1   :  { %v1207_v55 = vpop.eup %1206 }
0x19b2   :  { %v163_v56 = vmul.f32 0.6931472, %v1207_v55 }
0x19b4   :  { %1021 = vpush %v163_v56 }
0x19e0   :  { %s1020_s13 = spop %1019 }
0x19e5   :  { %s1022_s14 = spop %1021 }
0x19e6   :  { %s165_s15 = ssub.f32 %s1020_s13, %s1022_s14 }
0x19e8   :  { %s166_s16 = ssub.f32 0.0, %s165_s15 }
0x19ea   :  { %v994_v9 = vstv %s166_s16 }
0x19eb   :  { %v995_v11 = vsel %vm993_vm0, %v994_v9, 0.0 }
0x1a09   :  { %v966_v60 = vpop.xlane.xlu1 %965 }
0x1a0a   :  { %v967_v61 = vrot.slane %v966_v60, 4 }
0x1a0c   :  { %v968_v63 = vadd.f32 %v967_v61, %v966_v60 }
0x1a0e   :  { %v969_v1 = vrot.slane %v968_v63, 2 }
0x1a10   :  { %v970_v2 = vadd.f32 %v969_v1, %v968_v63 }
0x1a12   :  { %v971_v4 = vrot.slane %v970_v2, 1 }
0x1a14   :  { %v972_v5 = vadd.f32 %v971_v4, %v970_v2 }
0x1a16   :  { %1023 = vpush %v972_v5 }
0x1a17   :  { %1025 = vpush %v988_v6 }
0x1a47   :  { %s1024_s17 = spop %1023 }
0x1a48   :  { %s974_s18 = smul.f32 0.1, %s1024_s17  ;;  %s1026_s19 = spop %1025 }
0x1a49   :  { %s990_s20 = smul.f32 0.125, %s1026_s19 }
0x1a4a   :  { %v997_v10 = vstv %s974_s18 }
0x1a4b   :  { %v998_v12 = vsel %vm996_vm1, %v997_v10, 0.0  ;;  %v1001_v13 = vstv %s990_s20 }
0x1a4c   :  { %v999_v15 = vadd.f32 %v998_v12, %v995_v11  ;;  %v1002_v16 = vsel %vm1000_vm4, %v1001_v13, 0.0 }
0x1a4e   :  { %v1003_v17 = vadd.f32 %v1002_v16, %v999_v15 }
0x1a50   :  { %1004 = vst [vmem:[%s1420_s6] sm:$0x1] %v1003_v17 }

</bundles_post_ra>
